<compile_context>
chip_gen: v6e
topology: v6e:2x2x1
jax: 0.10.0
libtpu: 0.0.40
codegen_flags: <defaults>
</compile_context>

<pallas_src>
import jax
import jax.numpy as jnp
from jax.experimental import pallas as pl
from jax.experimental.pallas import tpu as pltpu

BT = 8  # batch rows per grid step = one sublane tile


def _lstm_classifier_kernel(x_ref, wih_ref, whh_ref, b_ref,
                            fc1w_ref, fc1b_ref, fc2w_ref, fc2b_ref,
                            h0_ref, c0_ref,
                            out_ref, hn_ref, cn_ref,
                            xw_ref):
    L, _, G4 = wih_ref.shape          # (L, H, 4H), g-gate columns pre-scaled x2
    H = G4 // 4
    Bt = hn_ref.shape[1]              # batch rows in this tile (== BT)
    T = x_ref.shape[1] // Bt

    # Weights loaded once into vregs (L is small).
    wih = [wih_ref[l] for l in range(L)]
    whh = [whh_ref[l] for l in range(L)]
    b_bc = [None] * L
    for l in range(1, L):             # layer 0's bias is folded into xw below
        b_bc[l] = jnp.broadcast_to(b_ref[l], (Bt, G4))   # hoisted broadcast

    # Hoisted layer-0 input projection: one (T*Bt, H) x (H, 4H) matmul,
    # completely off the recurrent dependency chain.
    xw_ref[...] = (jnp.dot(x_ref[0], wih[0], preferred_element_type=jnp.float32)
                   + b_ref[0])

    # State lives in vregs for the whole recurrence.
    h = [h0_ref[l] for l in range(L)]
    c = [c0_ref[l] for l in range(L)]

    def cell(pre, h_prev, c_prev):
        # One sigmoid pass over the whole gate tile; tanh(g) = 2*sigmoid(2g)-1
        # because the g-gate pre-activation was scaled by 2 in the wrapper.
        sg = jax.nn.sigmoid(pre)
        i_g = sg[:, 0 * H:1 * H]
        f_g = sg[:, 1 * H:2 * H]
        g_g = 2.0 * sg[:, 2 * H:3 * H] - 1.0
        o_g = sg[:, 3 * H:4 * H]
        c_new = f_g * c_prev + i_g * g_g
        h_new = o_g * jnp.tanh(c_new)
        return h_new, c_new

    # Wavefront schedule: diagonal s runs layer l at time t = s - l.  Layers
    # are visited high -> low so layer l consumes h[l-1] (time t) before layer
    # l-1 overwrites it with time t+1 inside the same diagonal.  The cells of
    # one diagonal are independent, so the LLO scheduler can interleave their
    # MXU / EUP / VPU work.
    for s in range(T + L - 1):
        for l in range(L - 1, -1, -1):
            t = s - l
            if 0 <= t < T:
                if l == 0:
                    pre = (xw_ref[t * Bt:(t + 1) * Bt, :]
                           + jnp.dot(h[0], whh[0],
                                     preferred_element_type=jnp.float32))
                else:
                    pre = (jnp.dot(h[l - 1], wih[l],
                                   preferred_element_type=jnp.float32)
                           + jnp.dot(h[l], whh[l],
                                     preferred_element_type=jnp.float32)
                           + b_bc[l])
                h[l], c[l] = cell(pre, h[l], c[l])

    # Final states written back exactly once per layer (refs alias h0/c0).
    for l in range(L):
        hn_ref[l] = h[l]
        cn_ref[l] = c[l]

    # Classifier head.  sig_out[:, -1] of the reference depends only on the
    # top layer's final hidden state.  Dropout is eval-mode identity.
    z1 = (jnp.dot(h[L - 1], fc1w_ref[...], preferred_element_type=jnp.float32)
          + fc1b_ref[...])
    act = jnp.maximum(z1, 0.0)
    z2 = (jnp.dot(act, fc2w_ref[...], preferred_element_type=jnp.float32)
          + fc2b_ref[...])
    out_ref[...] = jax.nn.sigmoid(z2)          # (Bt, 128) lane-dense; col 0 real


@jax.jit
def naive_classifier_forward(x, hidden, params):
    """x: (B, T, E) batch-first; hidden = (h0, c0), each (L, B, H)."""
    h0, c0 = hidden
    B, T, E = x.shape
    L, _, H = h0.shape
    assert E == H, "this kernel requires embedding_dim == hidden_dim"

    n_bt = (B + BT - 1) // BT
    B_pad = n_bt * BT
    OUT_PAD = 128            # lane-dense head output
    FC1_PAD = 256            # 200 -> 256 so head tiles are full lane tiles

    # Fold x2 into the g-gate (columns 2H:3H) so the kernel needs only one
    # sigmoid pass per step (tanh(g) = 2*sigmoid(2g) - 1).
    def scale_g(w):
        return w.at[..., 2 * H:3 * H].multiply(2.0)

    w_ih = scale_g(params["w_ih"].astype(jnp.float32))
    w_hh = scale_g(params["w_hh"].astype(jnp.float32))
    b = scale_g(params["b"].astype(jnp.float32))

    # Batch padded to full sublane tiles; x rearranged to
    # (batch_tile, T*BT time-major rows, H) so each grid step reads one slab.
    x_p = jnp.zeros((B_pad, T, H), jnp.float32).at[:B].set(x.astype(jnp.float32))
    x_arr = (x_p.reshape(n_bt, BT, T, H)
                .transpose(0, 2, 1, 3)
                .reshape(n_bt, T * BT, H))

    h0_p = jnp.zeros((L, B_pad, H), jnp.float32).at[:, :B].set(h0.astype(jnp.float32))
    c0_p = jnp.zeros((L, B_pad, H), jnp.float32).at[:, :B].set(c0.astype(jnp.float32))

    # Head weights padded to full lane tiles (zero padding is numerically inert:
    # padded fc2 rows are zero, so padded fc1 lanes never contribute).
    fc1_w = jnp.zeros((H, FC1_PAD), jnp.float32).at[:, :200].set(params["fc1_w"])
    fc1_b = jnp.zeros((1, FC1_PAD), jnp.float32).at[:, :200].set(params["fc1_b"])
    fc2_w = jnp.zeros((FC1_PAD, OUT_PAD), jnp.float32).at[:200, :1].set(params["fc2_w"])
    fc2_b = jnp.zeros((1, OUT_PAD), jnp.float32).at[:, :1].set(params["fc2_b"])

    grid_spec = pltpu.PrefetchScalarGridSpec(
        num_scalar_prefetch=0,
        grid=(n_bt,),
        in_specs=[
            pl.BlockSpec((1, T * BT, H), lambda i: (i, 0, 0)),       # x (per tile)
            pl.BlockSpec((L, H, 4 * H), lambda i: (0, 0, 0)),        # w_ih
            pl.BlockSpec((L, H, 4 * H), lambda i: (0, 0, 0)),        # w_hh
            pl.BlockSpec((L, 1, 4 * H), lambda i: (0, 0, 0)),        # b
            pl.BlockSpec((H, FC1_PAD), lambda i: (0, 0)),            # fc1_w
            pl.BlockSpec((1, FC1_PAD), lambda i: (0, 0)),            # fc1_b
            pl.BlockSpec((FC1_PAD, OUT_PAD), lambda i: (0, 0)),      # fc2_w
            pl.BlockSpec((1, OUT_PAD), lambda i: (0, 0)),            # fc2_b
            pl.BlockSpec((L, BT, H), lambda i: (0, i, 0)),           # h0
            pl.BlockSpec((L, BT, H), lambda i: (0, i, 0)),           # c0
        ],
        out_specs=[
            pl.BlockSpec((BT, OUT_PAD), lambda i: (i, 0)),           # sigmoid out
            pl.BlockSpec((L, BT, H), lambda i: (0, i, 0)),           # hn
            pl.BlockSpec((L, BT, H), lambda i: (0, i, 0)),           # cn
        ],
        scratch_shapes=[pltpu.VMEM((T * BT, 4 * H), jnp.float32)],   # hoisted x@W_ih
    )

    out, hn, cn = pl.pallas_call(
        _lstm_classifier_kernel,
        out_shape=(
            jax.ShapeDtypeStruct((B_pad, OUT_PAD), jnp.float32),
            jax.ShapeDtypeStruct((L, B_pad, H), jnp.float32),
            jax.ShapeDtypeStruct((L, B_pad, H), jnp.float32),
        ),
        grid_spec=grid_spec,
        input_output_aliases={8: 1, 9: 2},      # h0 -> hn, c0 -> cn
        compiler_params=pltpu.CompilerParams(
            dimension_semantics=("parallel",)),  # batch tiles -> both v7x TCs
    )(x_arr, w_ih, w_hh, b, fc1_w, fc1_b, fc2_w, fc2_b, h0_p, c0_p)

    sig_out = out[:B, 0]                        # == sig_out[:, -1] of the reference
    return sig_out, (hn[:, :B], cn[:, :B])


def init_params(key, no_layers, hidden_dim, embedding_dim):
    assert embedding_dim == hidden_dim
    H = hidden_dim
    ks = jax.random.split(key, 8)
    s = 1.0 / jnp.sqrt(H)
    w_ih = jax.random.uniform(ks[0], (no_layers, embedding_dim, 4 * H),
                              jnp.float32, -s, s)              # pre-transposed
    w_hh = jax.random.uniform(ks[1], (no_layers, H, 4 * H), jnp.float32, -s, s)
    b_ih = jax.random.uniform(ks[2], (no_layers, 1, 4 * H), jnp.float32, -s, s)
    b_hh = jax.random.uniform(ks[3], (no_layers, 1, 4 * H), jnp.float32, -s, s)
    s1 = 1.0 / jnp.sqrt(H)
    fc1_w = jax.random.uniform(ks[4], (H, 200), jnp.float32, -s1, s1)
    fc1_b = jax.random.uniform(ks[5], (1, 200), jnp.float32, -s1, s1)
    s2 = 1.0 / jnp.sqrt(200.0)
    fc2_w = jax.random.uniform(ks[6], (200, 1), jnp.float32, -s2, s2)
    fc2_b = jax.random.uniform(ks[7], (1, 1), jnp.float32, -s2, s2)
    return dict(w_ih=w_ih, w_hh=w_hh, b=b_ih + b_hh,
                fc1_w=fc1_w, fc1_b=fc1_b, fc2_w=fc2_w, fc2_b=fc2_b)


def reference_forward(x, hidden, params):
    """Pure-JAX reference reproducing the PyTorch forward (eval-mode dropout)."""
    h0, c0 = hidden
    L, B, H = h0.shape
    T = x.shape[1]
    seq = x.astype(jnp.float32)
    h = [h0[l] for l in range(L)]
    c = [c0[l] for l in range(L)]
    for l in range(L):
        outs = []
        for t in range(T):
            x_t = seq[:, t, :]
            gates = x_t @ params["w_ih"][l] + h[l] @ params["w_hh"][l] + params["b"][l]
            i_g = jax.nn.sigmoid(gates[:, 0:H])
            f_g = jax.nn.sigmoid(gates[:, H:2 * H])
            g_g = jnp.tanh(gates[:, 2 * H:3 * H])
            o_g = jax.nn.sigmoid(gates[:, 3 * H:4 * H])
            c[l] = f_g * c[l] + i_g * g_g
            h[l] = o_g * jnp.tanh(c[l])
            outs.append(h[l])
        seq = jnp.stack(outs, axis=1)
    h_last = seq[:, -1, :]
    z1 = jnp.maximum(h_last @ params["fc1_w"] + params["fc1_b"], 0.0)
    z2 = z1 @ params["fc2_w"] + params["fc2_b"]
    return jax.nn.sigmoid(z2)[:, 0], (jnp.stack(h), jnp.stack(c))


if __name__ == "__main__":
    no_layers, hidden_dim, embedding_dim = 2, 32, 32
    batch, seq_len = 2, 8

    key = jax.random.PRNGKey(0)
    k_x, k_p = jax.random.split(key)
    x = jax.random.normal(k_x, (batch, seq_len, embedding_dim), jnp.float32)
    params = init_params(k_p, no_layers, hidden_dim, embedding_dim)

    # init_hidden(batch_size)
    h0 = jnp.zeros((no_layers, batch, hidden_dim), jnp.float32)
    c0 = jnp.zeros((no_layers, batch, hidden_dim), jnp.float32)

    sig_out, (hn, cn) = naive_classifier_forward(x, (h0, c0), params)
    jax.block_until_ready((sig_out, hn, cn))

    ref_sig, (ref_hn, ref_cn) = reference_forward(x, (h0, c0), params)
    assert sig_out.shape == (batch,)
    assert hn.shape == (no_layers, batch, hidden_dim)
    assert cn.shape == (no_layers, batch, hidden_dim)
    assert jnp.allclose(sig_out, ref_sig, atol=2e-5, rtol=2e-5)
    assert jnp.allclose(hn, ref_hn, atol=2e-5, rtol=2e-5)
    assert jnp.allclose(cn, ref_cn, atol=2e-5, rtol=2e-5)

    print("KERNEL_OK")
</pallas_src>

<mosaic_0001>
module attributes {stable_mosaic.version = 11 : i64} {
  func.func @_lstm_classifier_kernel(%arg0: i32, %arg1: memref<1x64x32xf32, #tpu.memory_space<vmem>>, %arg2: memref<2x32x128xf32, #tpu.memory_space<vmem>>, %arg3: memref<2x32x128xf32, #tpu.memory_space<vmem>>, %arg4: memref<2x1x128xf32, #tpu.memory_space<vmem>>, %arg5: memref<32x256xf32, #tpu.memory_space<vmem>>, %arg6: memref<1x256xf32, #tpu.memory_space<vmem>>, %arg7: memref<256x128xf32, #tpu.memory_space<vmem>>, %arg8: memref<1x128xf32, #tpu.memory_space<vmem>>, %arg9: memref<2x8x32xf32, #tpu.memory_space<vmem>>, %arg10: memref<2x8x32xf32, #tpu.memory_space<vmem>>, %arg11: memref<8x128xf32, #tpu.memory_space<vmem>>, %arg12: memref<2x8x32xf32, #tpu.memory_space<vmem>>, %arg13: memref<2x8x32xf32, #tpu.memory_space<vmem>>, %arg14: memref<64x128xf32, #tpu.memory_space<vmem>>) attributes {dimension_semantics = [#tpu.dimension_semantics<parallel>], iteration_bounds = array<i64: 1>, scalar_prefetch = 0 : i64, scratch_operands = 1 : i64, tpu.core_type = #tpu.core_type<tc>, window_params = [{transform_indices = @transform_0, window_bounds = array<i64: 1, 64, 32>}, {pipeline_mode = #tpu.pipeline_mode<synchronous>, transform_indices = @transform_1, window_bounds = array<i64: 2, 32, 128>}, {pipeline_mode = #tpu.pipeline_mode<synchronous>, transform_indices = @transform_2, window_bounds = array<i64: 2, 32, 128>}, {pipeline_mode = #tpu.pipeline_mode<synchronous>, transform_indices = @transform_3, window_bounds = array<i64: 2, 1, 128>}, {pipeline_mode = #tpu.pipeline_mode<synchronous>, transform_indices = @transform_4, window_bounds = array<i64: 32, 256>}, {pipeline_mode = #tpu.pipeline_mode<synchronous>, transform_indices = @transform_5, window_bounds = array<i64: 1, 256>}, {pipeline_mode = #tpu.pipeline_mode<synchronous>, transform_indices = @transform_6, window_bounds = array<i64: 256, 128>}, {pipeline_mode = #tpu.pipeline_mode<synchronous>, transform_indices = @transform_7, window_bounds = array<i64: 1, 128>}, {transform_indices = @transform_8, window_bounds = array<i64: 2, 8, 32>}, {transform_indices = @transform_9, window_bounds = array<i64: 2, 8, 32>}, {transform_indices = @transform_10, window_bounds = array<i64: 8, 128>}, {transform_indices = @transform_11, window_bounds = array<i64: 2, 8, 32>}, {transform_indices = @transform_12, window_bounds = array<i64: 2, 8, 32>}]} {
    %c0 = arith.constant 0 : index
    %c0_0 = arith.constant 0 : index
    %c0_1 = arith.constant 0 : index
    %0 = vector.load %arg2[%c0, %c0_0, %c0_1] : memref<2x32x128xf32, #tpu.memory_space<vmem>>, vector<1x32x128xf32>
    %1 = vector.shape_cast %0 : vector<1x32x128xf32> to vector<32x128xf32>
    %c1 = arith.constant 1 : index
    %c0_2 = arith.constant 0 : index
    %c0_3 = arith.constant 0 : index
    %2 = vector.load %arg2[%c1, %c0_2, %c0_3] : memref<2x32x128xf32, #tpu.memory_space<vmem>>, vector<1x32x128xf32>
    %3 = vector.shape_cast %2 : vector<1x32x128xf32> to vector<32x128xf32>
    %c0_4 = arith.constant 0 : index
    %c0_5 = arith.constant 0 : index
    %c0_6 = arith.constant 0 : index
    %4 = vector.load %arg3[%c0_4, %c0_5, %c0_6] : memref<2x32x128xf32, #tpu.memory_space<vmem>>, vector<1x32x128xf32>
    %5 = vector.shape_cast %4 : vector<1x32x128xf32> to vector<32x128xf32>
    %c1_7 = arith.constant 1 : index
    %c0_8 = arith.constant 0 : index
    %c0_9 = arith.constant 0 : index
    %6 = vector.load %arg3[%c1_7, %c0_8, %c0_9] : memref<2x32x128xf32, #tpu.memory_space<vmem>>, vector<1x32x128xf32>
    %7 = vector.shape_cast %6 : vector<1x32x128xf32> to vector<32x128xf32>
    %c1_10 = arith.constant 1 : index
    %c0_11 = arith.constant 0 : index
    %c0_12 = arith.constant 0 : index
    %8 = vector.load %arg4[%c1_10, %c0_11, %c0_12] : memref<2x1x128xf32, #tpu.memory_space<vmem>>, vector<1x1x128xf32>
    %9 = vector.shape_cast %8 : vector<1x1x128xf32> to vector<1x128xf32>
    %10 = vector.shape_cast %9 : vector<1x128xf32> to vector<1x128xf32>
    %11 = vector.broadcast %10 : vector<1x128xf32> to vector<8x128xf32>
    %c0_13 = arith.constant 0 : index
    %c0_14 = arith.constant 0 : index
    %c0_15 = arith.constant 0 : index
    %12 = vector.load %arg1[%c0_13, %c0_14, %c0_15] : memref<1x64x32xf32, #tpu.memory_space<vmem>>, vector<1x64x32xf32>
    %13 = vector.shape_cast %12 : vector<1x64x32xf32> to vector<64x32xf32>
    %cst = arith.constant dense<0.000000e+00> : vector<64x128xf32>
    %14 = tpu.matmul %13, %1, %cst {dimension_numbers = #tpu.dot_dimension_numbers<[1], [0], [0], [1], [0, 0, 1, 1], [], []>} : vector<64x32xf32>, vector<32x128xf32>, vector<64x128xf32> -> vector<64x128xf32>
    %c0_16 = arith.constant 0 : index
    %c0_17 = arith.constant 0 : index
    %c0_18 = arith.constant 0 : index
    %15 = vector.load %arg4[%c0_16, %c0_17, %c0_18] : memref<2x1x128xf32, #tpu.memory_space<vmem>>, vector<1x1x128xf32>
    %16 = vector.shape_cast %15 : vector<1x1x128xf32> to vector<1x128xf32>
    %17 = vector.broadcast %16 : vector<1x128xf32> to vector<64x128xf32>
    %18 = arith.addf %14, %17 : vector<64x128xf32>
    %c0_19 = arith.constant 0 : index
    %c0_20 = arith.constant 0 : index
    %19 = vector.load %arg14[%c0_19, %c0_20] : memref<64x128xf32, #tpu.memory_space<vmem>>, vector<64x128xf32>
    tpu.vector_store %arg14[%c0_19, %c0_20], %18 {strides = array<i32>} : memref<64x128xf32, #tpu.memory_space<vmem>>, vector<64x128xf32>,
    %c0_21 = arith.constant 0 : index
    %c0_22 = arith.constant 0 : index
    %c0_23 = arith.constant 0 : index
    %20 = vector.load %arg9[%c0_21, %c0_22, %c0_23] : memref<2x8x32xf32, #tpu.memory_space<vmem>>, vector<1x8x32xf32>
    %21 = vector.shape_cast %20 : vector<1x8x32xf32> to vector<8x32xf32>
    %c1_24 = arith.constant 1 : index
    %c0_25 = arith.constant 0 : index
    %c0_26 = arith.constant 0 : index
    %22 = vector.load %arg9[%c1_24, %c0_25, %c0_26] : memref<2x8x32xf32, #tpu.memory_space<vmem>>, vector<1x8x32xf32>
    %23 = vector.shape_cast %22 : vector<1x8x32xf32> to vector<8x32xf32>
    %c0_27 = arith.constant 0 : index
    %c0_28 = arith.constant 0 : index
    %c0_29 = arith.constant 0 : index
    %24 = vector.load %arg10[%c0_27, %c0_28, %c0_29] : memref<2x8x32xf32, #tpu.memory_space<vmem>>, vector<1x8x32xf32>
    %25 = vector.shape_cast %24 : vector<1x8x32xf32> to vector<8x32xf32>
    %c1_30 = arith.constant 1 : index
    %c0_31 = arith.constant 0 : index
    %c0_32 = arith.constant 0 : index
    %26 = vector.load %arg10[%c1_30, %c0_31, %c0_32] : memref<2x8x32xf32, #tpu.memory_space<vmem>>, vector<1x8x32xf32>
    %27 = vector.shape_cast %26 : vector<1x8x32xf32> to vector<8x32xf32>
    %c0_33 = arith.constant 0 : index
    %c0_34 = arith.constant 0 : index
    %28 = vector.load %arg14[%c0_33, %c0_34] : memref<64x128xf32, #tpu.memory_space<vmem>>, vector<8x128xf32>
    %cst_35 = arith.constant dense<0.000000e+00> : vector<8x128xf32>
    %29 = tpu.matmul %21, %5, %cst_35 {dimension_numbers = #tpu.dot_dimension_numbers<[1], [0], [0], [1], [0, 0, 1, 1], [], []>} : vector<8x32xf32>, vector<32x128xf32>, vector<8x128xf32> -> vector<8x128xf32>
    %30 = arith.addf %28, %29 : vector<8x128xf32>
    %31 = arith.negf %30 : vector<8x128xf32>
    %32 = math.exp %31 : vector<8x128xf32>
    %cst_36 = arith.constant 1.000000e+00 : f32
    %33 = vector.broadcast %cst_36 : f32 to vector<8x128xf32>
    %34 = arith.addf %33, %32 : vector<8x128xf32>
    %35 = arith.divf %33, %34 : vector<8x128xf32>
    %36 = vector.extract_strided_slice %35 {offsets = [0, 0], sizes = [8, 32], strides = [1, 1]} : vector<8x128xf32> to vector<8x32xf32>
    %37 = vector.extract_strided_slice %35 {offsets = [0, 32], sizes = [8, 32], strides = [1, 1]} : vector<8x128xf32> to vector<8x32xf32>
    %38 = vector.extract_strided_slice %35 {offsets = [0, 64], sizes = [8, 32], strides = [1, 1]} : vector<8x128xf32> to vector<8x32xf32>
    %cst_37 = arith.constant 2.000000e+00 : f32
    %39 = vector.broadcast %cst_37 : f32 to vector<8x32xf32>
    %40 = arith.mulf %39, %38 : vector<8x32xf32>
    %cst_38 = arith.constant 1.000000e+00 : f32
    %41 = vector.broadcast %cst_38 : f32 to vector<8x32xf32>
    %42 = arith.subf %40, %41 : vector<8x32xf32>
    %43 = vector.extract_strided_slice %35 {offsets = [0, 96], sizes = [8, 32], strides = [1, 1]} : vector<8x128xf32> to vector<8x32xf32>
    %44 = arith.mulf %37, %25 : vector<8x32xf32>
    %45 = arith.mulf %36, %42 : vector<8x32xf32>
    %46 = arith.addf %44, %45 : vector<8x32xf32>
    %47 = math.tanh %46 : vector<8x32xf32>
    %48 = arith.mulf %43, %47 : vector<8x32xf32>
    %cst_39 = arith.constant dense<0.000000e+00> : vector<8x128xf32>
    %49 = tpu.matmul %48, %3, %cst_39 {dimension_numbers = #tpu.dot_dimension_numbers<[1], [0], [0], [1], [0, 0, 1, 1], [], []>} : vector<8x32xf32>, vector<32x128xf32>, vector<8x128xf32> -> vector<8x128xf32>
    %cst_40 = arith.constant dense<0.000000e+00> : vector<8x128xf32>
    %50 = tpu.matmul %23, %7, %cst_40 {dimension_numbers = #tpu.dot_dimension_numbers<[1], [0], [0], [1], [0, 0, 1, 1], [], []>} : vector<8x32xf32>, vector<32x128xf32>, vector<8x128xf32> -> vector<8x128xf32>
    %51 = arith.addf %49, %50 : vector<8x128xf32>
    %52 = arith.addf %51, %11 : vector<8x128xf32>
    %53 = arith.negf %52 : vector<8x128xf32>
    %54 = math.exp %53 : vector<8x128xf32>
    %cst_41 = arith.constant 1.000000e+00 : f32
    %55 = vector.broadcast %cst_41 : f32 to vector<8x128xf32>
    %56 = arith.addf %55, %54 : vector<8x128xf32>
    %57 = arith.divf %55, %56 : vector<8x128xf32>
    %58 = vector.extract_strided_slice %57 {offsets = [0, 0], sizes = [8, 32], strides = [1, 1]} : vector<8x128xf32> to vector<8x32xf32>
    %59 = vector.extract_strided_slice %57 {offsets = [0, 32], sizes = [8, 32], strides = [1, 1]} : vector<8x128xf32> to vector<8x32xf32>
    %60 = vector.extract_strided_slice %57 {offsets = [0, 64], sizes = [8, 32], strides = [1, 1]} : vector<8x128xf32> to vector<8x32xf32>
    %cst_42 = arith.constant 2.000000e+00 : f32
    %61 = vector.broadcast %cst_42 : f32 to vector<8x32xf32>
    %62 = arith.mulf %61, %60 : vector<8x32xf32>
    %cst_43 = arith.constant 1.000000e+00 : f32
    %63 = vector.broadcast %cst_43 : f32 to vector<8x32xf32>
    %64 = arith.subf %62, %63 : vector<8x32xf32>
    %65 = vector.extract_strided_slice %57 {offsets = [0, 96], sizes = [8, 32], strides = [1, 1]} : vector<8x128xf32> to vector<8x32xf32>
    %66 = arith.mulf %59, %27 : vector<8x32xf32>
    %67 = arith.mulf %58, %64 : vector<8x32xf32>
    %68 = arith.addf %66, %67 : vector<8x32xf32>
    %69 = math.tanh %68 : vector<8x32xf32>
    %70 = arith.mulf %65, %69 : vector<8x32xf32>
    %c8 = arith.constant 8 : index
    %c0_44 = arith.constant 0 : index
    %71 = vector.load %arg14[%c8, %c0_44] : memref<64x128xf32, #tpu.memory_space<vmem>>, vector<8x128xf32>
    %cst_45 = arith.constant dense<0.000000e+00> : vector<8x128xf32>
    %72 = tpu.matmul %48, %5, %cst_45 {dimension_numbers = #tpu.dot_dimension_numbers<[1], [0], [0], [1], [0, 0, 1, 1], [], []>} : vector<8x32xf32>, vector<32x128xf32>, vector<8x128xf32> -> vector<8x128xf32>
    %73 = arith.addf %71, %72 : vector<8x128xf32>
    %74 = arith.negf %73 : vector<8x128xf32>
    %75 = math.exp %74 : vector<8x128xf32>
    %cst_46 = arith.constant 1.000000e+00 : f32
    %76 = vector.broadcast %cst_46 : f32 to vector<8x128xf32>
    %77 = arith.addf %76, %75 : vector<8x128xf32>
    %78 = arith.divf %76, %77 : vector<8x128xf32>
    %79 = vector.extract_strided_slice %78 {offsets = [0, 0], sizes = [8, 32], strides = [1, 1]} : vector<8x128xf32> to vector<8x32xf32>
    %80 = vector.extract_strided_slice %78 {offsets = [0, 32], sizes = [8, 32], strides = [1, 1]} : vector<8x128xf32> to vector<8x32xf32>
    %81 = vector.extract_strided_slice %78 {offsets = [0, 64], sizes = [8, 32], strides = [1, 1]} : vector<8x128xf32> to vector<8x32xf32>
    %cst_47 = arith.constant 2.000000e+00 : f32
    %82 = vector.broadcast %cst_47 : f32 to vector<8x32xf32>
    %83 = arith.mulf %82, %81 : vector<8x32xf32>
    %cst_48 = arith.constant 1.000000e+00 : f32
    %84 = vector.broadcast %cst_48 : f32 to vector<8x32xf32>
    %85 = arith.subf %83, %84 : vector<8x32xf32>
    %86 = vector.extract_strided_slice %78 {offsets = [0, 96], sizes = [8, 32], strides = [1, 1]} : vector<8x128xf32> to vector<8x32xf32>
    %87 = arith.mulf %80, %46 : vector<8x32xf32>
    %88 = arith.mulf %79, %85 : vector<8x32xf32>
    %89 = arith.addf %87, %88 : vector<8x32xf32>
    %90 = math.tanh %89 : vector<8x32xf32>
    %91 = arith.mulf %86, %90 : vector<8x32xf32>
    %cst_49 = arith.constant dense<0.000000e+00> : vector<8x128xf32>
    %92 = tpu.matmul %91, %3, %cst_49 {dimension_numbers = #tpu.dot_dimension_numbers<[1], [0], [0], [1], [0, 0, 1, 1], [], []>} : vector<8x32xf32>, vector<32x128xf32>, vector<8x128xf32> -> vector<8x128xf32>
    %cst_50 = arith.constant dense<0.000000e+00> : vector<8x128xf32>
    %93 = tpu.matmul %70, %7, %cst_50 {dimension_numbers = #tpu.dot_dimension_numbers<[1], [0], [0], [1], [0, 0, 1, 1], [], []>} : vector<8x32xf32>, vector<32x128xf32>, vector<8x128xf32> -> vector<8x128xf32>
    %94 = arith.addf %92, %93 : vector<8x128xf32>
    %95 = arith.addf %94, %11 : vector<8x128xf32>
    %96 = arith.negf %95 : vector<8x128xf32>
    %97 = math.exp %96 : vector<8x128xf32>
    %cst_51 = arith.constant 1.000000e+00 : f32
    %98 = vector.broadcast %cst_51 : f32 to vector<8x128xf32>
    %99 = arith.addf %98, %97 : vector<8x128xf32>
    %100 = arith.divf %98, %99 : vector<8x128xf32>
    %101 = vector.extract_strided_slice %100 {offsets = [0, 0], sizes = [8, 32], strides = [1, 1]} : vector<8x128xf32> to vector<8x32xf32>
    %102 = vector.extract_strided_slice %100 {offsets = [0, 32], sizes = [8, 32], strides = [1, 1]} : vector<8x128xf32> to vector<8x32xf32>
    %103 = vector.extract_strided_slice %100 {offsets = [0, 64], sizes = [8, 32], strides = [1, 1]} : vector<8x128xf32> to vector<8x32xf32>
    %cst_52 = arith.constant 2.000000e+00 : f32
    %104 = vector.broadcast %cst_52 : f32 to vector<8x32xf32>
    %105 = arith.mulf %104, %103 : vector<8x32xf32>
    %cst_53 = arith.constant 1.000000e+00 : f32
    %106 = vector.broadcast %cst_53 : f32 to vector<8x32xf32>
    %107 = arith.subf %105, %106 : vector<8x32xf32>
    %108 = vector.extract_strided_slice %100 {offsets = [0, 96], sizes = [8, 32], strides = [1, 1]} : vector<8x128xf32> to vector<8x32xf32>
    %109 = arith.mulf %102, %68 : vector<8x32xf32>
    %110 = arith.mulf %101, %107 : vector<8x32xf32>
    %111 = arith.addf %109, %110 : vector<8x32xf32>
    %112 = math.tanh %111 : vector<8x32xf32>
    %113 = arith.mulf %108, %112 : vector<8x32xf32>
    %c16 = arith.constant 16 : index
    %c0_54 = arith.constant 0 : index
    %114 = vector.load %arg14[%c16, %c0_54] : memref<64x128xf32, #tpu.memory_space<vmem>>, vector<8x128xf32>
    %cst_55 = arith.constant dense<0.000000e+00> : vector<8x128xf32>
    %115 = tpu.matmul %91, %5, %cst_55 {dimension_numbers = #tpu.dot_dimension_numbers<[1], [0], [0], [1], [0, 0, 1, 1], [], []>} : vector<8x32xf32>, vector<32x128xf32>, vector<8x128xf32> -> vector<8x128xf32>
    %116 = arith.addf %114, %115 : vector<8x128xf32>
    %117 = arith.negf %116 : vector<8x128xf32>
    %118 = math.exp %117 : vector<8x128xf32>
    %cst_56 = arith.constant 1.000000e+00 : f32
    %119 = vector.broadcast %cst_56 : f32 to vector<8x128xf32>
    %120 = arith.addf %119, %118 : vector<8x128xf32>
    %121 = arith.divf %119, %120 : vector<8x128xf32>
    %122 = vector.extract_strided_slice %121 {offsets = [0, 0], sizes = [8, 32], strides = [1, 1]} : vector<8x128xf32> to vector<8x32xf32>
    %123 = vector.extract_strided_slice %121 {offsets = [0, 32], sizes = [8, 32], strides = [1, 1]} : vector<8x128xf32> to vector<8x32xf32>
    %124 = vector.extract_strided_slice %121 {offsets = [0, 64], sizes = [8, 32], strides = [1, 1]} : vector<8x128xf32> to vector<8x32xf32>
    %cst_57 = arith.constant 2.000000e+00 : f32
    %125 = vector.broadcast %cst_57 : f32 to vector<8x32xf32>
    %126 = arith.mulf %125, %124 : vector<8x32xf32>
    %cst_58 = arith.constant 1.000000e+00 : f32
    %127 = vector.broadcast %cst_58 : f32 to vector<8x32xf32>
    %128 = arith.subf %126, %127 : vector<8x32xf32>
    %129 = vector.extract_strided_slice %121 {offsets = [0, 96], sizes = [8, 32], strides = [1, 1]} : vector<8x128xf32> to vector<8x32xf32>
    %130 = arith.mulf %123, %89 : vector<8x32xf32>
    %131 = arith.mulf %122, %128 : vector<8x32xf32>
    %132 = arith.addf %130, %131 : vector<8x32xf32>
    %133 = math.tanh %132 : vector<8x32xf32>
    %134 = arith.mulf %129, %133 : vector<8x32xf32>
    %cst_59 = arith.constant dense<0.000000e+00> : vector<8x128xf32>
    %135 = tpu.matmul %134, %3, %cst_59 {dimension_numbers = #tpu.dot_dimension_numbers<[1], [0], [0], [1], [0, 0, 1, 1], [], []>} : vector<8x32xf32>, vector<32x128xf32>, vector<8x128xf32> -> vector<8x128xf32>
    %cst_60 = arith.constant dense<0.000000e+00> : vector<8x128xf32>
    %136 = tpu.matmul %113, %7, %cst_60 {dimension_numbers = #tpu.dot_dimension_numbers<[1], [0], [0], [1], [0, 0, 1, 1], [], []>} : vector<8x32xf32>, vector<32x128xf32>, vector<8x128xf32> -> vector<8x128xf32>
    %137 = arith.addf %135, %136 : vector<8x128xf32>
    %138 = arith.addf %137, %11 : vector<8x128xf32>
    %139 = arith.negf %138 : vector<8x128xf32>
    %140 = math.exp %139 : vector<8x128xf32>
    %cst_61 = arith.constant 1.000000e+00 : f32
    %141 = vector.broadcast %cst_61 : f32 to vector<8x128xf32>
    %142 = arith.addf %141, %140 : vector<8x128xf32>
    %143 = arith.divf %141, %142 : vector<8x128xf32>
    %144 = vector.extract_strided_slice %143 {offsets = [0, 0], sizes = [8, 32], strides = [1, 1]} : vector<8x128xf32> to vector<8x32xf32>
    %145 = vector.extract_strided_slice %143 {offsets = [0, 32], sizes = [8, 32], strides = [1, 1]} : vector<8x128xf32> to vector<8x32xf32>
    %146 = vector.extract_strided_slice %143 {offsets = [0, 64], sizes = [8, 32], strides = [1, 1]} : vector<8x128xf32> to vector<8x32xf32>
    %cst_62 = arith.constant 2.000000e+00 : f32
    %147 = vector.broadcast %cst_62 : f32 to vector<8x32xf32>
    %148 = arith.mulf %147, %146 : vector<8x32xf32>
    %cst_63 = arith.constant 1.000000e+00 : f32
    %149 = vector.broadcast %cst_63 : f32 to vector<8x32xf32>
    %150 = arith.subf %148, %149 : vector<8x32xf32>
    %151 = vector.extract_strided_slice %143 {offsets = [0, 96], sizes = [8, 32], strides = [1, 1]} : vector<8x128xf32> to vector<8x32xf32>
    %152 = arith.mulf %145, %111 : vector<8x32xf32>
    %153 = arith.mulf %144, %150 : vector<8x32xf32>
    %154 = arith.addf %152, %153 : vector<8x32xf32>
    %155 = math.tanh %154 : vector<8x32xf32>
    %156 = arith.mulf %151, %155 : vector<8x32xf32>
    %c24 = arith.constant 24 : index
    %c0_64 = arith.constant 0 : index
    %157 = vector.load %arg14[%c24, %c0_64] : memref<64x128xf32, #tpu.memory_space<vmem>>, vector<8x128xf32>
    %cst_65 = arith.constant dense<0.000000e+00> : vector<8x128xf32>
    %158 = tpu.matmul %134, %5, %cst_65 {dimension_numbers = #tpu.dot_dimension_numbers<[1], [0], [0], [1], [0, 0, 1, 1], [], []>} : vector<8x32xf32>, vector<32x128xf32>, vector<8x128xf32> -> vector<8x128xf32>
    %159 = arith.addf %157, %158 : vector<8x128xf32>
    %160 = arith.negf %159 : vector<8x128xf32>
    %161 = math.exp %160 : vector<8x128xf32>
    %cst_66 = arith.constant 1.000000e+00 : f32
    %162 = vector.broadcast %cst_66 : f32 to vector<8x128xf32>
    %163 = arith.addf %162, %161 : vector<8x128xf32>
    %164 = arith.divf %162, %163 : vector<8x128xf32>
    %165 = vector.extract_strided_slice %164 {offsets = [0, 0], sizes = [8, 32], strides = [1, 1]} : vector<8x128xf32> to vector<8x32xf32>
    %166 = vector.extract_strided_slice %164 {offsets = [0, 32], sizes = [8, 32], strides = [1, 1]} : vector<8x128xf32> to vector<8x32xf32>
    %167 = vector.extract_strided_slice %164 {offsets = [0, 64], sizes = [8, 32], strides = [1, 1]} : vector<8x128xf32> to vector<8x32xf32>
    %cst_67 = arith.constant 2.000000e+00 : f32
    %168 = vector.broadcast %cst_67 : f32 to vector<8x32xf32>
    %169 = arith.mulf %168, %167 : vector<8x32xf32>
    %cst_68 = arith.constant 1.000000e+00 : f32
    %170 = vector.broadcast %cst_68 : f32 to vector<8x32xf32>
    %171 = arith.subf %169, %170 : vector<8x32xf32>
    %172 = vector.extract_strided_slice %164 {offsets = [0, 96], sizes = [8, 32], strides = [1, 1]} : vector<8x128xf32> to vector<8x32xf32>
    %173 = arith.mulf %166, %132 : vector<8x32xf32>
    %174 = arith.mulf %165, %171 : vector<8x32xf32>
    %175 = arith.addf %173, %174 : vector<8x32xf32>
    %176 = math.tanh %175 : vector<8x32xf32>
    %177 = arith.mulf %172, %176 : vector<8x32xf32>
    %cst_69 = arith.constant dense<0.000000e+00> : vector<8x128xf32>
    %178 = tpu.matmul %177, %3, %cst_69 {dimension_numbers = #tpu.dot_dimension_numbers<[1], [0], [0], [1], [0, 0, 1, 1], [], []>} : vector<8x32xf32>, vector<32x128xf32>, vector<8x128xf32> -> vector<8x128xf32>
    %cst_70 = arith.constant dense<0.000000e+00> : vector<8x128xf32>
    %179 = tpu.matmul %156, %7, %cst_70 {dimension_numbers = #tpu.dot_dimension_numbers<[1], [0], [0], [1], [0, 0, 1, 1], [], []>} : vector<8x32xf32>, vector<32x128xf32>, vector<8x128xf32> -> vector<8x128xf32>
    %180 = arith.addf %178, %179 : vector<8x128xf32>
    %181 = arith.addf %180, %11 : vector<8x128xf32>
    %182 = arith.negf %181 : vector<8x128xf32>
    %183 = math.exp %182 : vector<8x128xf32>
    %cst_71 = arith.constant 1.000000e+00 : f32
    %184 = vector.broadcast %cst_71 : f32 to vector<8x128xf32>
    %185 = arith.addf %184, %183 : vector<8x128xf32>
    %186 = arith.divf %184, %185 : vector<8x128xf32>
    %187 = vector.extract_strided_slice %186 {offsets = [0, 0], sizes = [8, 32], strides = [1, 1]} : vector<8x128xf32> to vector<8x32xf32>
    %188 = vector.extract_strided_slice %186 {offsets = [0, 32], sizes = [8, 32], strides = [1, 1]} : vector<8x128xf32> to vector<8x32xf32>
    %189 = vector.extract_strided_slice %186 {offsets = [0, 64], sizes = [8, 32], strides = [1, 1]} : vector<8x128xf32> to vector<8x32xf32>
    %cst_72 = arith.constant 2.000000e+00 : f32
    %190 = vector.broadcast %cst_72 : f32 to vector<8x32xf32>
    %191 = arith.mulf %190, %189 : vector<8x32xf32>
    %cst_73 = arith.constant 1.000000e+00 : f32
    %192 = vector.broadcast %cst_73 : f32 to vector<8x32xf32>
    %193 = arith.subf %191, %192 : vector<8x32xf32>
    %194 = vector.extract_strided_slice %186 {offsets = [0, 96], sizes = [8, 32], strides = [1, 1]} : vector<8x128xf32> to vector<8x32xf32>
    %195 = arith.mulf %188, %154 : vector<8x32xf32>
    %196 = arith.mulf %187, %193 : vector<8x32xf32>
    %197 = arith.addf %195, %196 : vector<8x32xf32>
    %198 = math.tanh %197 : vector<8x32xf32>
    %199 = arith.mulf %194, %198 : vector<8x32xf32>
    %c32 = arith.constant 32 : index
    %c0_74 = arith.constant 0 : index
    %200 = vector.load %arg14[%c32, %c0_74] : memref<64x128xf32, #tpu.memory_space<vmem>>, vector<8x128xf32>
    %cst_75 = arith.constant dense<0.000000e+00> : vector<8x128xf32>
    %201 = tpu.matmul %177, %5, %cst_75 {dimension_numbers = #tpu.dot_dimension_numbers<[1], [0], [0], [1], [0, 0, 1, 1], [], []>} : vector<8x32xf32>, vector<32x128xf32>, vector<8x128xf32> -> vector<8x128xf32>
    %202 = arith.addf %200, %201 : vector<8x128xf32>
    %203 = arith.negf %202 : vector<8x128xf32>
    %204 = math.exp %203 : vector<8x128xf32>
    %cst_76 = arith.constant 1.000000e+00 : f32
    %205 = vector.broadcast %cst_76 : f32 to vector<8x128xf32>
    %206 = arith.addf %205, %204 : vector<8x128xf32>
    %207 = arith.divf %205, %206 : vector<8x128xf32>
    %208 = vector.extract_strided_slice %207 {offsets = [0, 0], sizes = [8, 32], strides = [1, 1]} : vector<8x128xf32> to vector<8x32xf32>
    %209 = vector.extract_strided_slice %207 {offsets = [0, 32], sizes = [8, 32], strides = [1, 1]} : vector<8x128xf32> to vector<8x32xf32>
    %210 = vector.extract_strided_slice %207 {offsets = [0, 64], sizes = [8, 32], strides = [1, 1]} : vector<8x128xf32> to vector<8x32xf32>
    %cst_77 = arith.constant 2.000000e+00 : f32
    %211 = vector.broadcast %cst_77 : f32 to vector<8x32xf32>
    %212 = arith.mulf %211, %210 : vector<8x32xf32>
    %cst_78 = arith.constant 1.000000e+00 : f32
    %213 = vector.broadcast %cst_78 : f32 to vector<8x32xf32>
    %214 = arith.subf %212, %213 : vector<8x32xf32>
    %215 = vector.extract_strided_slice %207 {offsets = [0, 96], sizes = [8, 32], strides = [1, 1]} : vector<8x128xf32> to vector<8x32xf32>
    %216 = arith.mulf %209, %175 : vector<8x32xf32>
    %217 = arith.mulf %208, %214 : vector<8x32xf32>
    %218 = arith.addf %216, %217 : vector<8x32xf32>
    %219 = math.tanh %218 : vector<8x32xf32>
    %220 = arith.mulf %215, %219 : vector<8x32xf32>
    %cst_79 = arith.constant dense<0.000000e+00> : vector<8x128xf32>
    %221 = tpu.matmul %220, %3, %cst_79 {dimension_numbers = #tpu.dot_dimension_numbers<[1], [0], [0], [1], [0, 0, 1, 1], [], []>} : vector<8x32xf32>, vector<32x128xf32>, vector<8x128xf32> -> vector<8x128xf32>
    %cst_80 = arith.constant dense<0.000000e+00> : vector<8x128xf32>
    %222 = tpu.matmul %199, %7, %cst_80 {dimension_numbers = #tpu.dot_dimension_numbers<[1], [0], [0], [1], [0, 0, 1, 1], [], []>} : vector<8x32xf32>, vector<32x128xf32>, vector<8x128xf32> -> vector<8x128xf32>
    %223 = arith.addf %221, %222 : vector<8x128xf32>
    %224 = arith.addf %223, %11 : vector<8x128xf32>
    %225 = arith.negf %224 : vector<8x128xf32>
    %226 = math.exp %225 : vector<8x128xf32>
    %cst_81 = arith.constant 1.000000e+00 : f32
    %227 = vector.broadcast %cst_81 : f32 to vector<8x128xf32>
    %228 = arith.addf %227, %226 : vector<8x128xf32>
    %229 = arith.divf %227, %228 : vector<8x128xf32>
    %230 = vector.extract_strided_slice %229 {offsets = [0, 0], sizes = [8, 32], strides = [1, 1]} : vector<8x128xf32> to vector<8x32xf32>
    %231 = vector.extract_strided_slice %229 {offsets = [0, 32], sizes = [8, 32], strides = [1, 1]} : vector<8x128xf32> to vector<8x32xf32>
    %232 = vector.extract_strided_slice %229 {offsets = [0, 64], sizes = [8, 32], strides = [1, 1]} : vector<8x128xf32> to vector<8x32xf32>
    %cst_82 = arith.constant 2.000000e+00 : f32
    %233 = vector.broadcast %cst_82 : f32 to vector<8x32xf32>
    %234 = arith.mulf %233, %232 : vector<8x32xf32>
    %cst_83 = arith.constant 1.000000e+00 : f32
    %235 = vector.broadcast %cst_83 : f32 to vector<8x32xf32>
    %236 = arith.subf %234, %235 : vector<8x32xf32>
    %237 = vector.extract_strided_slice %229 {offsets = [0, 96], sizes = [8, 32], strides = [1, 1]} : vector<8x128xf32> to vector<8x32xf32>
    %238 = arith.mulf %231, %197 : vector<8x32xf32>
    %239 = arith.mulf %230, %236 : vector<8x32xf32>
    %240 = arith.addf %238, %239 : vector<8x32xf32>
    %241 = math.tanh %240 : vector<8x32xf32>
    %242 = arith.mulf %237, %241 : vector<8x32xf32>
    %c40 = arith.constant 40 : index
    %c0_84 = arith.constant 0 : index
    %243 = vector.load %arg14[%c40, %c0_84] : memref<64x128xf32, #tpu.memory_space<vmem>>, vector<8x128xf32>
    %cst_85 = arith.constant dense<0.000000e+00> : vector<8x128xf32>
    %244 = tpu.matmul %220, %5, %cst_85 {dimension_numbers = #tpu.dot_dimension_numbers<[1], [0], [0], [1], [0, 0, 1, 1], [], []>} : vector<8x32xf32>, vector<32x128xf32>, vector<8x128xf32> -> vector<8x128xf32>
    %245 = arith.addf %243, %244 : vector<8x128xf32>
    %246 = arith.negf %245 : vector<8x128xf32>
    %247 = math.exp %246 : vector<8x128xf32>
    %cst_86 = arith.constant 1.000000e+00 : f32
    %248 = vector.broadcast %cst_86 : f32 to vector<8x128xf32>
    %249 = arith.addf %248, %247 : vector<8x128xf32>
    %250 = arith.divf %248, %249 : vector<8x128xf32>
    %251 = vector.extract_strided_slice %250 {offsets = [0, 0], sizes = [8, 32], strides = [1, 1]} : vector<8x128xf32> to vector<8x32xf32>
    %252 = vector.extract_strided_slice %250 {offsets = [0, 32], sizes = [8, 32], strides = [1, 1]} : vector<8x128xf32> to vector<8x32xf32>
    %253 = vector.extract_strided_slice %250 {offsets = [0, 64], sizes = [8, 32], strides = [1, 1]} : vector<8x128xf32> to vector<8x32xf32>
    %cst_87 = arith.constant 2.000000e+00 : f32
    %254 = vector.broadcast %cst_87 : f32 to vector<8x32xf32>
    %255 = arith.mulf %254, %253 : vector<8x32xf32>
    %cst_88 = arith.constant 1.000000e+00 : f32
    %256 = vector.broadcast %cst_88 : f32 to vector<8x32xf32>
    %257 = arith.subf %255, %256 : vector<8x32xf32>
    %258 = vector.extract_strided_slice %250 {offsets = [0, 96], sizes = [8, 32], strides = [1, 1]} : vector<8x128xf32> to vector<8x32xf32>
    %259 = arith.mulf %252, %218 : vector<8x32xf32>
    %260 = arith.mulf %251, %257 : vector<8x32xf32>
    %261 = arith.addf %259, %260 : vector<8x32xf32>
    %262 = math.tanh %261 : vector<8x32xf32>
    %263 = arith.mulf %258, %262 : vector<8x32xf32>
    %cst_89 = arith.constant dense<0.000000e+00> : vector<8x128xf32>
    %264 = tpu.matmul %263, %3, %cst_89 {dimension_numbers = #tpu.dot_dimension_numbers<[1], [0], [0], [1], [0, 0, 1, 1], [], []>} : vector<8x32xf32>, vector<32x128xf32>, vector<8x128xf32> -> vector<8x128xf32>
    %cst_90 = arith.constant dense<0.000000e+00> : vector<8x128xf32>
    %265 = tpu.matmul %242, %7, %cst_90 {dimension_numbers = #tpu.dot_dimension_numbers<[1], [0], [0], [1], [0, 0, 1, 1], [], []>} : vector<8x32xf32>, vector<32x128xf32>, vector<8x128xf32> -> vector<8x128xf32>
    %266 = arith.addf %264, %265 : vector<8x128xf32>
    %267 = arith.addf %266, %11 : vector<8x128xf32>
    %268 = arith.negf %267 : vector<8x128xf32>
    %269 = math.exp %268 : vector<8x128xf32>
    %cst_91 = arith.constant 1.000000e+00 : f32
    %270 = vector.broadcast %cst_91 : f32 to vector<8x128xf32>
    %271 = arith.addf %270, %269 : vector<8x128xf32>
    %272 = arith.divf %270, %271 : vector<8x128xf32>
    %273 = vector.extract_strided_slice %272 {offsets = [0, 0], sizes = [8, 32], strides = [1, 1]} : vector<8x128xf32> to vector<8x32xf32>
    %274 = vector.extract_strided_slice %272 {offsets = [0, 32], sizes = [8, 32], strides = [1, 1]} : vector<8x128xf32> to vector<8x32xf32>
    %275 = vector.extract_strided_slice %272 {offsets = [0, 64], sizes = [8, 32], strides = [1, 1]} : vector<8x128xf32> to vector<8x32xf32>
    %cst_92 = arith.constant 2.000000e+00 : f32
    %276 = vector.broadcast %cst_92 : f32 to vector<8x32xf32>
    %277 = arith.mulf %276, %275 : vector<8x32xf32>
    %cst_93 = arith.constant 1.000000e+00 : f32
    %278 = vector.broadcast %cst_93 : f32 to vector<8x32xf32>
    %279 = arith.subf %277, %278 : vector<8x32xf32>
    %280 = vector.extract_strided_slice %272 {offsets = [0, 96], sizes = [8, 32], strides = [1, 1]} : vector<8x128xf32> to vector<8x32xf32>
    %281 = arith.mulf %274, %240 : vector<8x32xf32>
    %282 = arith.mulf %273, %279 : vector<8x32xf32>
    %283 = arith.addf %281, %282 : vector<8x32xf32>
    %284 = math.tanh %283 : vector<8x32xf32>
    %285 = arith.mulf %280, %284 : vector<8x32xf32>
    %c48 = arith.constant 48 : index
    %c0_94 = arith.constant 0 : index
    %286 = vector.load %arg14[%c48, %c0_94] : memref<64x128xf32, #tpu.memory_space<vmem>>, vector<8x128xf32>
    %cst_95 = arith.constant dense<0.000000e+00> : vector<8x128xf32>
    %287 = tpu.matmul %263, %5, %cst_95 {dimension_numbers = #tpu.dot_dimension_numbers<[1], [0], [0], [1], [0, 0, 1, 1], [], []>} : vector<8x32xf32>, vector<32x128xf32>, vector<8x128xf32> -> vector<8x128xf32>
    %288 = arith.addf %286, %287 : vector<8x128xf32>
    %289 = arith.negf %288 : vector<8x128xf32>
    %290 = math.exp %289 : vector<8x128xf32>
    %cst_96 = arith.constant 1.000000e+00 : f32
    %291 = vector.broadcast %cst_96 : f32 to vector<8x128xf32>
    %292 = arith.addf %291, %290 : vector<8x128xf32>
    %293 = arith.divf %291, %292 : vector<8x128xf32>
    %294 = vector.extract_strided_slice %293 {offsets = [0, 0], sizes = [8, 32], strides = [1, 1]} : vector<8x128xf32> to vector<8x32xf32>
    %295 = vector.extract_strided_slice %293 {offsets = [0, 32], sizes = [8, 32], strides = [1, 1]} : vector<8x128xf32> to vector<8x32xf32>
    %296 = vector.extract_strided_slice %293 {offsets = [0, 64], sizes = [8, 32], strides = [1, 1]} : vector<8x128xf32> to vector<8x32xf32>
    %cst_97 = arith.constant 2.000000e+00 : f32
    %297 = vector.broadcast %cst_97 : f32 to vector<8x32xf32>
    %298 = arith.mulf %297, %296 : vector<8x32xf32>
    %cst_98 = arith.constant 1.000000e+00 : f32
    %299 = vector.broadcast %cst_98 : f32 to vector<8x32xf32>
    %300 = arith.subf %298, %299 : vector<8x32xf32>
    %301 = vector.extract_strided_slice %293 {offsets = [0, 96], sizes = [8, 32], strides = [1, 1]} : vector<8x128xf32> to vector<8x32xf32>
    %302 = arith.mulf %295, %261 : vector<8x32xf32>
    %303 = arith.mulf %294, %300 : vector<8x32xf32>
    %304 = arith.addf %302, %303 : vector<8x32xf32>
    %305 = math.tanh %304 : vector<8x32xf32>
    %306 = arith.mulf %301, %305 : vector<8x32xf32>
    %cst_99 = arith.constant dense<0.000000e+00> : vector<8x128xf32>
    %307 = tpu.matmul %306, %3, %cst_99 {dimension_numbers = #tpu.dot_dimension_numbers<[1], [0], [0], [1], [0, 0, 1, 1], [], []>} : vector<8x32xf32>, vector<32x128xf32>, vector<8x128xf32> -> vector<8x128xf32>
    %cst_100 = arith.constant dense<0.000000e+00> : vector<8x128xf32>
    %308 = tpu.matmul %285, %7, %cst_100 {dimension_numbers = #tpu.dot_dimension_numbers<[1], [0], [0], [1], [0, 0, 1, 1], [], []>} : vector<8x32xf32>, vector<32x128xf32>, vector<8x128xf32> -> vector<8x128xf32>
    %309 = arith.addf %307, %308 : vector<8x128xf32>
    %310 = arith.addf %309, %11 : vector<8x128xf32>
    %311 = arith.negf %310 : vector<8x128xf32>
    %312 = math.exp %311 : vector<8x128xf32>
    %cst_101 = arith.constant 1.000000e+00 : f32
    %313 = vector.broadcast %cst_101 : f32 to vector<8x128xf32>
    %314 = arith.addf %313, %312 : vector<8x128xf32>
    %315 = arith.divf %313, %314 : vector<8x128xf32>
    %316 = vector.extract_strided_slice %315 {offsets = [0, 0], sizes = [8, 32], strides = [1, 1]} : vector<8x128xf32> to vector<8x32xf32>
    %317 = vector.extract_strided_slice %315 {offsets = [0, 32], sizes = [8, 32], strides = [1, 1]} : vector<8x128xf32> to vector<8x32xf32>
    %318 = vector.extract_strided_slice %315 {offsets = [0, 64], sizes = [8, 32], strides = [1, 1]} : vector<8x128xf32> to vector<8x32xf32>
    %cst_102 = arith.constant 2.000000e+00 : f32
    %319 = vector.broadcast %cst_102 : f32 to vector<8x32xf32>
    %320 = arith.mulf %319, %318 : vector<8x32xf32>
    %cst_103 = arith.constant 1.000000e+00 : f32
    %321 = vector.broadcast %cst_103 : f32 to vector<8x32xf32>
    %322 = arith.subf %320, %321 : vector<8x32xf32>
    %323 = vector.extract_strided_slice %315 {offsets = [0, 96], sizes = [8, 32], strides = [1, 1]} : vector<8x128xf32> to vector<8x32xf32>
    %324 = arith.mulf %317, %283 : vector<8x32xf32>
    %325 = arith.mulf %316, %322 : vector<8x32xf32>
    %326 = arith.addf %324, %325 : vector<8x32xf32>
    %327 = math.tanh %326 : vector<8x32xf32>
    %328 = arith.mulf %323, %327 : vector<8x32xf32>
    %c56 = arith.constant 56 : index
    %c0_104 = arith.constant 0 : index
    %329 = vector.load %arg14[%c56, %c0_104] : memref<64x128xf32, #tpu.memory_space<vmem>>, vector<8x128xf32>
    %cst_105 = arith.constant dense<0.000000e+00> : vector<8x128xf32>
    %330 = tpu.matmul %306, %5, %cst_105 {dimension_numbers = #tpu.dot_dimension_numbers<[1], [0], [0], [1], [0, 0, 1, 1], [], []>} : vector<8x32xf32>, vector<32x128xf32>, vector<8x128xf32> -> vector<8x128xf32>
    %331 = arith.addf %329, %330 : vector<8x128xf32>
    %332 = arith.negf %331 : vector<8x128xf32>
    %333 = math.exp %332 : vector<8x128xf32>
    %cst_106 = arith.constant 1.000000e+00 : f32
    %334 = vector.broadcast %cst_106 : f32 to vector<8x128xf32>
    %335 = arith.addf %334, %333 : vector<8x128xf32>
    %336 = arith.divf %334, %335 : vector<8x128xf32>
    %337 = vector.extract_strided_slice %336 {offsets = [0, 0], sizes = [8, 32], strides = [1, 1]} : vector<8x128xf32> to vector<8x32xf32>
    %338 = vector.extract_strided_slice %336 {offsets = [0, 32], sizes = [8, 32], strides = [1, 1]} : vector<8x128xf32> to vector<8x32xf32>
    %339 = vector.extract_strided_slice %336 {offsets = [0, 64], sizes = [8, 32], strides = [1, 1]} : vector<8x128xf32> to vector<8x32xf32>
    %cst_107 = arith.constant 2.000000e+00 : f32
    %340 = vector.broadcast %cst_107 : f32 to vector<8x32xf32>
    %341 = arith.mulf %340, %339 : vector<8x32xf32>
    %cst_108 = arith.constant 1.000000e+00 : f32
    %342 = vector.broadcast %cst_108 : f32 to vector<8x32xf32>
    %343 = arith.subf %341, %342 : vector<8x32xf32>
    %344 = vector.extract_strided_slice %336 {offsets = [0, 96], sizes = [8, 32], strides = [1, 1]} : vector<8x128xf32> to vector<8x32xf32>
    %345 = arith.mulf %338, %304 : vector<8x32xf32>
    %346 = arith.mulf %337, %343 : vector<8x32xf32>
    %347 = arith.addf %345, %346 : vector<8x32xf32>
    %348 = math.tanh %347 : vector<8x32xf32>
    %349 = arith.mulf %344, %348 : vector<8x32xf32>
    %cst_109 = arith.constant dense<0.000000e+00> : vector<8x128xf32>
    %350 = tpu.matmul %349, %3, %cst_109 {dimension_numbers = #tpu.dot_dimension_numbers<[1], [0], [0], [1], [0, 0, 1, 1], [], []>} : vector<8x32xf32>, vector<32x128xf32>, vector<8x128xf32> -> vector<8x128xf32>
    %cst_110 = arith.constant dense<0.000000e+00> : vector<8x128xf32>
    %351 = tpu.matmul %328, %7, %cst_110 {dimension_numbers = #tpu.dot_dimension_numbers<[1], [0], [0], [1], [0, 0, 1, 1], [], []>} : vector<8x32xf32>, vector<32x128xf32>, vector<8x128xf32> -> vector<8x128xf32>
    %352 = arith.addf %350, %351 : vector<8x128xf32>
    %353 = arith.addf %352, %11 : vector<8x128xf32>
    %354 = arith.negf %353 : vector<8x128xf32>
    %355 = math.exp %354 : vector<8x128xf32>
    %cst_111 = arith.constant 1.000000e+00 : f32
    %356 = vector.broadcast %cst_111 : f32 to vector<8x128xf32>
    %357 = arith.addf %356, %355 : vector<8x128xf32>
    %358 = arith.divf %356, %357 : vector<8x128xf32>
    %359 = vector.extract_strided_slice %358 {offsets = [0, 0], sizes = [8, 32], strides = [1, 1]} : vector<8x128xf32> to vector<8x32xf32>
    %360 = vector.extract_strided_slice %358 {offsets = [0, 32], sizes = [8, 32], strides = [1, 1]} : vector<8x128xf32> to vector<8x32xf32>
    %361 = vector.extract_strided_slice %358 {offsets = [0, 64], sizes = [8, 32], strides = [1, 1]} : vector<8x128xf32> to vector<8x32xf32>
    %cst_112 = arith.constant 2.000000e+00 : f32
    %362 = vector.broadcast %cst_112 : f32 to vector<8x32xf32>
    %363 = arith.mulf %362, %361 : vector<8x32xf32>
    %cst_113 = arith.constant 1.000000e+00 : f32
    %364 = vector.broadcast %cst_113 : f32 to vector<8x32xf32>
    %365 = arith.subf %363, %364 : vector<8x32xf32>
    %366 = vector.extract_strided_slice %358 {offsets = [0, 96], sizes = [8, 32], strides = [1, 1]} : vector<8x128xf32> to vector<8x32xf32>
    %367 = arith.mulf %360, %326 : vector<8x32xf32>
    %368 = arith.mulf %359, %365 : vector<8x32xf32>
    %369 = arith.addf %367, %368 : vector<8x32xf32>
    %370 = math.tanh %369 : vector<8x32xf32>
    %371 = arith.mulf %366, %370 : vector<8x32xf32>
    %c0_114 = arith.constant 0 : index
    %c0_115 = arith.constant 0 : index
    %c0_116 = arith.constant 0 : index
    %372 = vector.load %arg12[%c0_114, %c0_115, %c0_116] : memref<2x8x32xf32, #tpu.memory_space<vmem>>, vector<1x8x32xf32>
    %373 = vector.shape_cast %372 : vector<1x8x32xf32> to vector<8x32xf32>
    %374 = vector.shape_cast %349 : vector<8x32xf32> to vector<1x8x32xf32>
    tpu.vector_store %arg12[%c0_114, %c0_115, %c0_116], %374 {strides = array<i32>} : memref<2x8x32xf32, #tpu.memory_space<vmem>>, vector<1x8x32xf32>,
    %c0_117 = arith.constant 0 : index
    %c0_118 = arith.constant 0 : index
    %c0_119 = arith.constant 0 : index
    %375 = vector.load %arg13[%c0_117, %c0_118, %c0_119] : memref<2x8x32xf32, #tpu.memory_space<vmem>>, vector<1x8x32xf32>
    %376 = vector.shape_cast %375 : vector<1x8x32xf32> to vector<8x32xf32>
    %377 = vector.shape_cast %347 : vector<8x32xf32> to vector<1x8x32xf32>
    tpu.vector_store %arg13[%c0_117, %c0_118, %c0_119], %377 {strides = array<i32>} : memref<2x8x32xf32, #tpu.memory_space<vmem>>, vector<1x8x32xf32>,
    %c1_120 = arith.constant 1 : index
    %c0_121 = arith.constant 0 : index
    %c0_122 = arith.constant 0 : index
    %378 = vector.load %arg12[%c1_120, %c0_121, %c0_122] : memref<2x8x32xf32, #tpu.memory_space<vmem>>, vector<1x8x32xf32>
    %379 = vector.shape_cast %378 : vector<1x8x32xf32> to vector<8x32xf32>
    %380 = vector.shape_cast %371 : vector<8x32xf32> to vector<1x8x32xf32>
    tpu.vector_store %arg12[%c1_120, %c0_121, %c0_122], %380 {strides = array<i32>} : memref<2x8x32xf32, #tpu.memory_space<vmem>>, vector<1x8x32xf32>,
    %c1_123 = arith.constant 1 : index
    %c0_124 = arith.constant 0 : index
    %c0_125 = arith.constant 0 : index
    %381 = vector.load %arg13[%c1_123, %c0_124, %c0_125] : memref<2x8x32xf32, #tpu.memory_space<vmem>>, vector<1x8x32xf32>
    %382 = vector.shape_cast %381 : vector<1x8x32xf32> to vector<8x32xf32>
    %383 = vector.shape_cast %369 : vector<8x32xf32> to vector<1x8x32xf32>
    tpu.vector_store %arg13[%c1_123, %c0_124, %c0_125], %383 {strides = array<i32>} : memref<2x8x32xf32, #tpu.memory_space<vmem>>, vector<1x8x32xf32>,
    %c0_126 = arith.constant 0 : index
    %c0_127 = arith.constant 0 : index
    %384 = vector.load %arg5[%c0_126, %c0_127] : memref<32x256xf32, #tpu.memory_space<vmem>>, vector<32x256xf32>
    %cst_128 = arith.constant dense<0.000000e+00> : vector<8x256xf32>
    %385 = tpu.matmul %371, %384, %cst_128 {dimension_numbers = #tpu.dot_dimension_numbers<[1], [0], [0], [1], [0, 0, 1, 1], [], []>} : vector<8x32xf32>, vector<32x256xf32>, vector<8x256xf32> -> vector<8x256xf32>
    %c0_129 = arith.constant 0 : index
    %c0_130 = arith.constant 0 : index
    %386 = vector.load %arg6[%c0_129, %c0_130] : memref<1x256xf32, #tpu.memory_space<vmem>>, vector<1x256xf32>
    %387 = vector.broadcast %386 : vector<1x256xf32> to vector<8x256xf32>
    %388 = arith.addf %385, %387 : vector<8x256xf32>
    %cst_131 = arith.constant 0.000000e+00 : f32
    %389 = vector.broadcast %cst_131 : f32 to vector<8x256xf32>
    %390 = arith.maximumf %388, %389 : vector<8x256xf32>
    %c0_132 = arith.constant 0 : index
    %c0_133 = arith.constant 0 : index
    %391 = vector.load %arg7[%c0_132, %c0_133] : memref<256x128xf32, #tpu.memory_space<vmem>>, vector<256x128xf32>
    %cst_134 = arith.constant dense<0.000000e+00> : vector<8x128xf32>
    %392 = tpu.matmul %390, %391, %cst_134 {dimension_numbers = #tpu.dot_dimension_numbers<[1], [0], [0], [1], [0, 0, 1, 1], [], []>} : vector<8x256xf32>, vector<256x128xf32>, vector<8x128xf32> -> vector<8x128xf32>
    %c0_135 = arith.constant 0 : index
    %c0_136 = arith.constant 0 : index
    %393 = vector.load %arg8[%c0_135, %c0_136] : memref<1x128xf32, #tpu.memory_space<vmem>>, vector<1x128xf32>
    %394 = vector.broadcast %393 : vector<1x128xf32> to vector<8x128xf32>
    %395 = arith.addf %392, %394 : vector<8x128xf32>
    %396 = arith.negf %395 : vector<8x128xf32>
    %397 = math.exp %396 : vector<8x128xf32>
    %cst_137 = arith.constant 1.000000e+00 : f32
    %398 = vector.broadcast %cst_137 : f32 to vector<8x128xf32>
    %399 = arith.addf %398, %397 : vector<8x128xf32>
    %400 = arith.divf %398, %399 : vector<8x128xf32>
    %c0_138 = arith.constant 0 : index
    %c0_139 = arith.constant 0 : index
    %401 = vector.load %arg11[%c0_138, %c0_139] : memref<8x128xf32, #tpu.memory_space<vmem>>, vector<8x128xf32>
    tpu.vector_store %arg11[%c0_138, %c0_139], %400 {strides = array<i32>} : memref<8x128xf32, #tpu.memory_space<vmem>>, vector<8x128xf32>,
    return
  }
  func.func @transform_0(%arg0: i32) -> (i32, i32, i32) {
    %c0_i32 = arith.constant 0 : i32
    %c0_i32_0 = arith.constant 0 : i32
    %c0_i32_1 = arith.constant 0 : i32
    return %arg0, %c0_i32, %c0_i32_0 : i32, i32, i32
  }
  func.func @transform_1(%arg0: i32) -> (i32, i32, i32) {
    %c0_i32 = arith.constant 0 : i32
    %c0_i32_0 = arith.constant 0 : i32
    %c0_i32_1 = arith.constant 0 : i32
    %c0_i32_2 = arith.constant 0 : i32
    return %c0_i32, %c0_i32_0, %c0_i32_1 : i32, i32, i32
  }
  func.func @transform_2(%arg0: i32) -> (i32, i32, i32) {
    %c0_i32 = arith.constant 0 : i32
    %c0_i32_0 = arith.constant 0 : i32
    %c0_i32_1 = arith.constant 0 : i32
    %c0_i32_2 = arith.constant 0 : i32
    return %c0_i32, %c0_i32_0, %c0_i32_1 : i32, i32, i32
  }
  func.func @transform_3(%arg0: i32) -> (i32, i32, i32) {
    %c0_i32 = arith.constant 0 : i32
    %c0_i32_0 = arith.constant 0 : i32
    %c0_i32_1 = arith.constant 0 : i32
    %c0_i32_2 = arith.constant 0 : i32
    return %c0_i32, %c0_i32_0, %c0_i32_1 : i32, i32, i32
  }
  func.func @transform_4(%arg0: i32) -> (i32, i32) {
    %c0_i32 = arith.constant 0 : i32
    %c0_i32_0 = arith.constant 0 : i32
    %c0_i32_1 = arith.constant 0 : i32
    return %c0_i32, %c0_i32_0 : i32, i32
  }
  func.func @transform_5(%arg0: i32) -> (i32, i32) {
    %c0_i32 = arith.constant 0 : i32
    %c0_i32_0 = arith.constant 0 : i32
    %c0_i32_1 = arith.constant 0 : i32
    return %c0_i32, %c0_i32_0 : i32, i32
  }
  func.func @transform_6(%arg0: i32) -> (i32, i32) {
    %c0_i32 = arith.constant 0 : i32
    %c0_i32_0 = arith.constant 0 : i32
    %c0_i32_1 = arith.constant 0 : i32
    return %c0_i32, %c0_i32_0 : i32, i32
  }
  func.func @transform_7(%arg0: i32) -> (i32, i32) {
    %c0_i32 = arith.constant 0 : i32
    %c0_i32_0 = arith.constant 0 : i32
    %c0_i32_1 = arith.constant 0 : i32
    return %c0_i32, %c0_i32_0 : i32, i32
  }
  func.func @transform_8(%arg0: i32) -> (i32, i32, i32) {
    %c0_i32 = arith.constant 0 : i32
    %c0_i32_0 = arith.constant 0 : i32
    %c0_i32_1 = arith.constant 0 : i32
    return %c0_i32, %arg0, %c0_i32_0 : i32, i32, i32
  }
  func.func @transform_9(%arg0: i32) -> (i32, i32, i32) {
    %c0_i32 = arith.constant 0 : i32
    %c0_i32_0 = arith.constant 0 : i32
    %c0_i32_1 = arith.constant 0 : i32
    return %c0_i32, %arg0, %c0_i32_0 : i32, i32, i32
  }
  func.func @transform_10(%arg0: i32) -> (i32, i32) {
    %c0_i32 = arith.constant 0 : i32
    %c0_i32_0 = arith.constant 0 : i32
    return %arg0, %c0_i32 : i32, i32
  }
  func.func @transform_11(%arg0: i32) -> (i32, i32, i32) {
    %c0_i32 = arith.constant 0 : i32
    %c0_i32_0 = arith.constant 0 : i32
    %c0_i32_1 = arith.constant 0 : i32
    return %c0_i32, %arg0, %c0_i32_0 : i32, i32, i32
  }
  func.func @transform_12(%arg0: i32) -> (i32, i32, i32) {
    %c0_i32 = arith.constant 0 : i32
    %c0_i32_0 = arith.constant 0 : i32
    %c0_i32_1 = arith.constant 0 : i32
    return %c0_i32, %arg0, %c0_i32_0 : i32, i32, i32
  }
}

</mosaic_0001>

<bundles_post_ra>
// kernel: naive_classifier_forward.1
= control target key start
LH: loop header
LB: loop body
LE: loop exit
PB: predicated region body
PF: predicated region fallthrough
CT: control target
= control target key end

     0   :  { %vm79_vm0 = vcmask 261120   ;;  %v3309_v2 = vmov 0.0   ;;  %vm3310_vm1 = vmmov 0   ;;  %s3312_s23 = smov 32   ;;  %s3313_s30 = smov 96   ;;  %s4101_s1 = inlined_call_operand.vmem [shape: f32[2,32,128], index: 1, kind: input, shape index: {}]   ;;  %s4102_s0 = inlined_call_operand.vmem [shape: f32[1,64,32], index: 0, kind: input, shape index: {}]   ;;  %s4103_s2 = inlined_call_operand.vmem [shape: f32[2,32,128], index: 2, kind: input, shape index: {}]   ;;  %s4104_s8 = inlined_call_operand.vmem [shape: f32[2,8,32], index: 8, kind: input, shape index: {}, may-alias: {8,11}]   ;;  %s4105_s3 = inlined_call_operand.vmem [shape: f32[2,1,128], index: 3, kind: input, shape index: {}]   ;;  %s4106_s9 = inlined_call_operand.vmem [shape: f32[2,8,32], index: 9, kind: input, shape index: {}, may-alias: {9,12}]   ;;  %s4107_s11 = inlined_call_operand.vmem [shape: f32[2,8,32], index: 11, kind: output, shape index: {1}, may-alias: {8,11}]   ;;  %s4108_s4 = inlined_call_operand.vmem [shape: f32[32,256], index: 4, kind: input, shape index: {}]   ;;  %s4109_s6 = inlined_call_operand.vmem [shape: f32[256,128], index: 6, kind: input, shape index: {}]   ;;  %s4110_s12 = inlined_call_operand.vmem [shape: f32[2,8,32], index: 12, kind: output, shape index: {2}, may-alias: {9,12}]   ;;  %s4111_s5 = inlined_call_operand.vmem [shape: f32[1,256], index: 5, kind: input, shape index: {}]   ;;  %s4112_s7 = inlined_call_operand.vmem [shape: f32[1,128], index: 7, kind: input, shape index: {}]   ;;  %s4113_s10 = inlined_call_operand.vmem [shape: f32[8,128], index: 10, kind: output, shape index: {0}]  }
   0x1   :  { %v41_v0 = vld [vmem:[%s4101_s1 + $0x18] sm:$0xff]  ;;  %v40_v1 = vld [vmem:[%s4101_s1 + $0x10] sm:$0xff]  ;;  %2938 = vmatprep.subr.mxu1 %v3309_v2  ;;  %2946 = vmatprep.mubr.msk.f32.mxu1 %vm3310_vm1, %v3309_v2  ;;  %v64_v3 = vld [vmem:[%s4102_s0] sm:$0xff] }
   0x2   :  { %2907 = vmatprep.subr.mxu0 %v41_v0  ;;  %v39_v4 = vld [vmem:[%s4101_s1 + $0x8] sm:$0xff]  ;;  %2915 = vmatprep.mubr.msk.f32.mxu0 %vm79_vm0, %v64_v3  ;;  %v38_v5 = vld [vmem:[%s4101_s1] sm:$0xff]  ;;  %v3404_v7 = vld [vmem:[%s4103_s2 + $0x18] sm:$0xff] }
   0x3   :  { %2908 = vmatpush3.msra.mxu0 %v41_v0  ;;  %v65_v6 = vld [vmem:[%s4102_s0 + $0x8] sm:$0xff]  ;;  %v66_v8 = vld [vmem:[%s4102_s0 + $0x10] sm:$0xff]  ;;  %v67_v10 = vld [vmem:[%s4102_s0 + $0x18] sm:$0xff] }
   0x4   :  { %2909 = vmatprep.subr.mxu0 %v40_v1  ;;  %v3414_v9 = vld [vmem:[%s4103_s2 + $0x10] sm:$0xff]  ;;  %v68_v11 = vld [vmem:[%s4102_s0 + $0x20] sm:$0xff]  ;;  %v3428_v12 = vld [vmem:[%s4103_s2 + $0x8] sm:$0xff] }
   0x5   :  { %2910 = vmatpush3.msra.mxu0 %v40_v1  ;;  %v3436_v13 = vld [vmem:[%s4103_s2] sm:$0xff]  ;;  %v69_v14 = vld [vmem:[%s4102_s0 + $0x28] sm:$0xff]  ;;  %v70_v15 = vld [vmem:[%s4102_s0 + $0x30] sm:$0xff] }
   0x6   :  { %2911 = vmatprep.subr.mxu0 %v39_v4  ;;  %v71_v16 = vld [vmem:[%s4102_s0 + $0x38] sm:$0xff]  ;;  %v217_v17 = vld [vmem:[%s4104_s8] sm:$0xff]  ;;  %s3311_s0 = smov 64   ;;  %v3497_v52 = vld [vmem:[%s4103_s2 + $0x30] sm:$0xff] }
   0x7   :  { %2912 = vmatpush3.msra.mxu0 %v39_v4  ;;  %v2668_v18 = vld [vmem:[%s4105_s3] ss:$0 sm:$0xff]  ;;  %v3492_v51 = vld [vmem:[%s4103_s2 + $0x38] sm:$0xff]  ;;  %v3509_v54 = vld [vmem:[%s4103_s2 + $0x28] sm:$0xff] }
   0x8   :  { %2913 = vmatprep.subr.mxu0 %v38_v5  ;;  %v220_v44 = vld [vmem:[%s4106_s9] sm:$0xff]  ;;  %2939 = vmatpush3.msra.mxu1 %v3492_v51  ;;  %v3503_v53 = vld [vmem:[%s4101_s1 + $0x38] sm:$0xff]  ;;  %v3515_v55 = vld [vmem:[%s4101_s1 + $0x30] sm:$0xff] }
   0x9   :  { %2914 = vmatpush3.msra.mxu0 %v38_v5  ;;  %2940 = vmatprep.subr.mxu1 %v3309_v2  ;;  %v3522_v56 = vld [vmem:[%s4101_s1 + $0x28] sm:$0xff]  ;;  %v3528_v57 = vld [vmem:[%s4103_s2 + $0x20] sm:$0xff] }
   0xa   :  { %2916 = vmatmul.mubr.msk.f32.vlgmr.msra.gmra.mxu0 %vm79_vm0, %v65_v6  ;;  %2927 = vmatprep.subr.mxu0 %v3309_v2  ;;  %v2677_v58 = vld [vmem:[%s4104_s8 + $0x8] sm:$0xff]  ;;  %v3541_v59 = vld [vmem:[%s4101_s1 + $0x20] sm:$0xff] }
   0xb   :  { %2928 = vmatpush3.msra.mxu0 %v3404_v7  ;;  %2918 = vmatprep.mubr.msk.f32.mxu0 %vm79_vm0, %v66_v8  ;;  %v3586_v3 = vld [vmem:[%s4105_s3 + $0x1] ss:$0 sm:$0xff] }
   0xc   :  { %2929 = vmatprep.subr.mxu0 %v3309_v2  ;;  %2941 = vmatpush3.msra.mxu1 %v3497_v52 }
   0xd   :  { %2930 = vmatpush3.msra.mxu0 %v3414_v9  ;;  %2942 = vmatprep.subr.mxu1 %v3309_v2 }
   0xe   :  { %2919 = vmatmul.mubr.msk.f32.gmra.mxu0 %vm79_vm0, %v67_v10  ;;  %2931 = vmatprep.subr.mxu0 %v3309_v2 }
   0xf   :  { %2921 = vmatprep.mubr.msk.f32.mxu0 %vm79_vm0, %v68_v11  ;;  %2932 = vmatpush3.msra.mxu0 %v3428_v12 }
  0x10   :  { %2933 = vmatprep.subr.mxu0 %v3309_v2  ;;  %2943 = vmatpush3.msra.mxu1 %v3509_v54 }
  0x11   :  { %2934 = vmatpush3.msra.mxu0 %v3436_v13  ;;  %2944 = vmatprep.subr.mxu1 %v3309_v2 }
  0x12   :  { %2922 = vmatmul.mubr.msk.f32.gmra.mxu0 %vm79_vm0, %v69_v14  ;;  %2949 = vmatprep.subr.mxu0 %v3309_v2 }
  0x13   :  { %2924 = vmatprep.mubr.msk.f32.mxu0 %vm79_vm0, %v70_v15  ;;  %2945 = vmatpush3.msra.mxu1 %v3528_v57 }
  0x14   :  { %2960 = vmatprep.subr.mxu1 %v3309_v2  ;;  %2947 = vmatmul.mubr.msk.f32.vlgmr.msra.gmra.mxu1 %vm79_vm0, %v2677_v58 }
  0x15   :  { %2961 = vmatpush3.msra.mxu1 %v3404_v7  ;;  %2968 = vmatprep.mubr.msk.f32.mxu1 %vm3310_vm1, %v3309_v2 }
  0x16   :  { %2925 = vmatmul.mubr.msk.f32.gmra.mxu0 %vm79_vm0, %v71_v16  ;;  %2962 = vmatprep.subr.mxu1 %v3309_v2 }
  0x17   :  { %2935 = vmatprep.mubr.msk.f32.mxu0 %vm3310_vm1, %v3309_v2  ;;  %2963 = vmatpush3.msra.mxu1 %v3414_v9 }
  0x18   :  { %2964 = vmatprep.subr.mxu1 %v3309_v2 }
  0x19   :  { %2965 = vmatpush3.msra.mxu1 %v3428_v12 }
  0x1a   :  { %2936 = vmatmul.mubr.msk.f32.vlgmr.msra.gmra.mxu0 %vm79_vm0, %v217_v17  ;;  %2966 = vmatprep.subr.mxu1 %v3309_v2 }
  0x1b   :  { %2957 = vmatprep.mubr.msk.f32.mxu0 %vm3310_vm1, %v3309_v2  ;;  %2950 = vmatpush3.msra.mxu0 %v3503_v53 }
  0x1c   :  { %2951 = vmatprep.subr.mxu0 %v3309_v2  ;;  %2967 = vmatpush3.msra.mxu1 %v3436_v13 }
  0x1d   :  { %2952 = vmatpush3.msra.mxu0 %v3515_v55  ;;  %2982 = vmatprep.subr.mxu1 %v3309_v2 }
  0x1e   :  { %2953 = vmatprep.subr.mxu0 %v3309_v2 }
  0x1f   :  { %2954 = vmatpush3.msra.mxu0 %v3522_v56 }
  0x20   :  { %2955 = vmatprep.subr.mxu0 %v3309_v2 }
  0x21   :  { %2956 = vmatpush3.msra.mxu0 %v3541_v59 }
  0x22   :  { %2971 = vmatprep.subr.mxu0 %v3309_v2 }
  0xca   :  { %v2917_v19 = vpop.f32.mrf.mxu0 }
  0xcb   :  { %v3466_v20 = vadd.f32 %v2917_v19, %v2668_v18 }
  0xcc   :  { %v170_v21 = vpop.f32.mrf.mxu0 }
  0xcd   :  { %v171_v33 = vadd.f32 %v2668_v18, %v170_v21 }
  0xce   :  { %v2920_v22 = vpop.f32.mrf.mxu0 }
  0xcf   :  { %v3468_v23 = vadd.f32 %v2920_v22, %v2668_v18 }
  0xd0   :  { %v180_v24 = vpop.f32.mrf.mxu0 }
  0xd1   :  { %v3470_v25 = vadd.f32 %v2668_v18, %v180_v24 }
  0xd2   :  { %v2923_v26 = vpop.f32.mrf.mxu0 }
  0xd3   :  { %v3472_v27 = vadd.f32 %v2923_v26, %v2668_v18 }
  0xd4   :  { %v190_v28 = vpop.f32.mrf.mxu0  ;;  %v396_v63 = vpop.f32.mrf.mxu1 }
  0xd5   :  { %v3474_v29 = vadd.f32 %v2668_v18, %v190_v28 }
  0xd6   :  { %v2926_v30 = vpop.f32.mrf.mxu0  ;;  %v2948_v0 = vpop.f32.mrf.mxu1 }
  0xd7   :  { %v3476_v31 = vadd.f32 %v2926_v30, %v2668_v18 }
  0xd8   :  { %v200_v32 = vpop.f32.mrf.mxu0 }
  0xd9   :  { %v3478_v34 = vadd.f32 %v2668_v18, %v200_v32  ;;  %v2678_v32 = vld [vmem:[%s4106_s9 + $0x8] sm:$0xff] }
  0xda   :  { %v293_v35 = vpop.f32.mrf.mxu0 }
  0xdb   :  { %v297_v36 = vadd.f32 %v293_v35, %v171_v33 }
  0xdc   :  { %v2937_v37 = vpop.f32.mrf.mxu0 }
  0xdd   :  { %v2680_v38 = vmul.f32 -1.442695, %v297_v36 }
  0xdf   :  { %3196 = vpow2.f32 %v2680_v38 }
  0xec   :  { %v3197_v39 = vpop.eup %3196 }
  0xed   :  { %v301_v40 = vadd.f32 1.0, %v3197_v39 }
  0xef   :  { %3198 = vrcp.f32 %v301_v40 }
  0xfc   :  { %v3199_v41 = vpop.eup %3198 }
  0xfd   :  { %v304_v42 = vmul.f32 2.0, %v3199_v41 }
  0xff   :  { %v2681_v43 = vadd.f32 -1.0, %v304_v42 }
 0x101   :  { %312 = vrot.lane.b32.xlu0 %v2681_v43, %s3311_s0 }
 0x105   :  { %307 = vrot.lane.b32.xlu0 %v220_v44, %s3312_s23 }
 0x173   :  { %v313_v45 = vpop.permute.xlu0 %312 }
 0x174   :  { %v315_v46 = vmul.f32 %v3199_v41, %v313_v45 }
 0x176   :  { %317 = vrot.lane.b32.xlu1 %v315_v46, %s3312_s23 }
 0x177   :  { %v308_v47 = vpop.permute.xlu0 %307 }
 0x178   :  { %v310_v48 = vmul.f32 %v3199_v41, %v308_v47 }
 0x1e8   :  { %v318_v49 = vpop.permute.xlu1 %317 }
 0x1e9   :  { %v3486_v50 = vadd.f32 %v318_v49, %v310_v48 }
 0x1eb   :  { %3200 = vtanh.f32 %v3486_v50 }
 0x1f8   :  { %v3201_v60 = vpop.eup %3200 }
 0x1f9   :  { %323 = vrot.lane.b32.xlu1 %v3201_v60, %s3311_s0 }
 0x26b   :  { %v324_v61 = vpop.permute.xlu1 %323 }
 0x26c   :  { %v326_v62 = vmul.f32 %v3199_v41, %v324_v61 }
 0x26e   :  { %401 = vrot.lane.b32.xlu0 %v326_v62, %s3312_s23 }
 0x2e0   :  { %v402_v1 = vpop.permute.xlu0 %401 }
 0x2e1   :  { %2958 = vmatmul.mubr.msk.f32.vlgmr.msra.gmra.mxu0 %vm79_vm0, %v402_v1  ;;  %2969 = vmatmul.mubr.msk.f32.vlgmr.msra.gmra.mxu1 %vm79_vm0, %v402_v1 }
 0x2e2   :  { %2983 = vmatpush3.msra.mxu1 %v3503_v53  ;;  %2972 = vmatpush3.msra.mxu0 %v3492_v51 }
 0x2e3   :  { %2984 = vmatprep.subr.mxu1 %v3309_v2  ;;  %2973 = vmatprep.subr.mxu0 %v3309_v2 }
 0x2e4   :  { %2985 = vmatpush3.msra.mxu1 %v3515_v55  ;;  %2974 = vmatpush3.msra.mxu0 %v3497_v52 }
 0x2e5   :  { %2986 = vmatprep.subr.mxu1 %v3309_v2  ;;  %2975 = vmatprep.subr.mxu0 %v3309_v2 }
 0x2e6   :  { %2987 = vmatpush3.msra.mxu1 %v3522_v56  ;;  %2976 = vmatpush3.msra.mxu0 %v3509_v54 }
 0x2e7   :  { %2988 = vmatprep.subr.mxu1 %v3309_v2  ;;  %2977 = vmatprep.subr.mxu0 %v3309_v2 }
 0x2e8   :  { %2989 = vmatpush3.msra.mxu1 %v3541_v59  ;;  %2990 = vmatprep.mubr.msk.f32.mxu1 %vm3310_vm1, %v3309_v2 }
 0x2e9   :  { %2978 = vmatpush3.msra.mxu0 %v3528_v57  ;;  %2979 = vmatprep.mubr.msk.f32.mxu0 %vm3310_vm1, %v3309_v2 }
 0x2ea   :  { %2993 = vmatprep.subr.mxu0 %v3309_v2  ;;  %3004 = vmatprep.subr.mxu1 %v3309_v2 }
 0x3a1   :  { %v471_v4 = vpop.f32.mrf.mxu0  ;;  %v572_v5 = vpop.f32.mrf.mxu1 }
 0x3a2   :  { %v472_v6 = vadd.f32 %v471_v4, %v396_v63  ;;  %v576_v8 = vadd.f32 %v572_v5, %v3466_v20 }
 0x3a3   :  { %v2959_v10 = vpop.f32.mrf.mxu0  ;;  %v2970_v11 = vpop.f32.mrf.mxu1 }
 0x3a4   :  { %v475_v14 = vadd.f32 %v3586_v3, %v472_v6  ;;  %v2687_v15 = vmul.f32 -1.442695, %v576_v8 }
 0x3a6   :  { %v2684_v16 = vmul.f32 -1.442695, %v475_v14  ;;  %3202 = vpow2.f32 %v2687_v15 }
 0x3a8   :  { %3204 = vpow2.f32 %v2684_v16 }
 0x3b3   :  { %v3203_v17 = vpop.eup %3202 }
 0x3b4   :  { %v580_v18 = vadd.f32 1.0, %v3203_v17 }
 0x3b5   :  { %v3205_v19 = vpop.eup %3204 }
 0x3b6   :  { %v479_v21 = vadd.f32 1.0, %v3205_v19  ;;  %3206 = vrcp.f32 %v580_v18 }
 0x3b8   :  { %3208 = vrcp.f32 %v479_v21 }
 0x3c3   :  { %v3207_v22 = vpop.eup %3206 }
 0x3c4   :  { %v583_v24 = vmul.f32 2.0, %v3207_v22  ;;  %v585_v39 = vmul.f32 %v3207_v22, %v3486_v50 }
 0x3c5   :  { %v3209_v26 = vpop.eup %3208 }
 0x3c6   :  { %v2688_v28 = vadd.f32 -1.0, %v583_v24  ;;  %v482_v30 = vmul.f32 2.0, %v3209_v26 }
 0x3c8   :  { %587 = vrot.lane.b32.xlu0 %v2688_v28, %s3311_s0  ;;  %v2685_v20 = vadd.f32 -1.0, %v482_v30 }
 0x3ca   :  { %490 = vrot.lane.b32.xlu1 %v2685_v20, %s3311_s0 }
 0x3ce   :  { %485 = vrot.lane.b32.xlu1 %v2678_v32, %s3312_s23 }
 0x43a   :  { %v588_v33 = vpop.permute.xlu0 %587 }
 0x43b   :  { %v590_v35 = vmul.f32 %v3207_v22, %v588_v33 }
 0x43c   :  { %v491_v36 = vpop.permute.xlu1 %490 }
 0x43d   :  { %v493_v37 = vmul.f32 %v3209_v26, %v491_v36  ;;  %592 = vrot.lane.b32.xlu1 %v590_v35, %s3312_s23 }
 0x43f   :  { %495 = vrot.lane.b32.xlu0 %v493_v37, %s3312_s23 }
 0x440   :  { %v486_v38 = vpop.permute.xlu1 %485 }
 0x441   :  { %v488_v41 = vmul.f32 %v3209_v26, %v486_v38 }
 0x4af   :  { %v593_v40 = vpop.permute.xlu1 %592 }
 0x4b0   :  { %v3599_v42 = vadd.f32 %v593_v40, %v585_v39 }
 0x4b1   :  { %v496_v43 = vpop.permute.xlu0 %495 }
 0x4b2   :  { %3210 = vtanh.f32 %v3599_v42  ;;  %v3602_v44 = vadd.f32 %v496_v43, %v488_v41 }
 0x4b4   :  { %3212 = vtanh.f32 %v3602_v44 }
 0x4bf   :  { %v3211_v45 = vpop.eup %3210 }
 0x4c0   :  { %598 = vrot.lane.b32.xlu1 %v3211_v45, %s3311_s0 }
 0x4c1   :  { %v3213_v46 = vpop.eup %3212 }
 0x4c2   :  { %501 = vrot.lane.b32.xlu0 %v3213_v46, %s3311_s0 }
 0x532   :  { %v599_v47 = vpop.permute.xlu1 %598 }
 0x533   :  { %v601_v48 = vmul.f32 %v3207_v22, %v599_v47 }
 0x534   :  { %v502_v49 = vpop.permute.xlu0 %501 }
 0x535   :  { %v504_v50 = vmul.f32 %v3209_v26, %v502_v49  ;;  %678 = vrot.lane.b32.xlu1 %v601_v48, %s3312_s23 }
 0x537   :  { %603 = vrot.lane.b32.xlu0 %v504_v50, %s3312_s23 }
 0x5a7   :  { %v679_v58 = vpop.permute.xlu1 %678 }
 0x5a8   :  { %2991 = vmatmul.mubr.msk.f32.vlgmr.msra.gmra.mxu1 %vm79_vm0, %v679_v58 }
 0x5a9   :  { %v604_v60 = vpop.permute.xlu0 %603  ;;  %3005 = vmatpush3.msra.mxu1 %v3492_v51  ;;  %3012 = vmatprep.mubr.msk.f32.mxu1 %vm3310_vm1, %v3309_v2 }
 0x5aa   :  { %2980 = vmatmul.mubr.msk.f32.vlgmr.msra.gmra.mxu0 %vm79_vm0, %v604_v60  ;;  %3006 = vmatprep.subr.mxu1 %v3309_v2 }
 0x5ab   :  { %2994 = vmatpush3.msra.mxu0 %v3404_v7  ;;  %3001 = vmatprep.mubr.msk.f32.mxu0 %vm3310_vm1, %v3309_v2 }
 0x5ac   :  { %2995 = vmatprep.subr.mxu0 %v3309_v2  ;;  %3007 = vmatpush3.msra.mxu1 %v3497_v52 }
 0x5ad   :  { %2996 = vmatpush3.msra.mxu0 %v3414_v9  ;;  %3008 = vmatprep.subr.mxu1 %v3309_v2 }
 0x5ae   :  { %2997 = vmatprep.subr.mxu0 %v3309_v2  ;;  %3009 = vmatpush3.msra.mxu1 %v3509_v54 }
 0x5af   :  { %2998 = vmatpush3.msra.mxu0 %v3428_v12  ;;  %3010 = vmatprep.subr.mxu1 %v3309_v2 }
 0x5b0   :  { %2999 = vmatprep.subr.mxu0 %v3309_v2  ;;  %3011 = vmatpush3.msra.mxu1 %v3528_v57 }
 0x5b1   :  { %3000 = vmatpush3.msra.mxu0 %v3436_v13  ;;  %3026 = vmatprep.subr.mxu1 %v3309_v2 }
 0x5b2   :  { %3002 = vmatmul.mubr.msk.f32.vlgmr.msra.gmra.mxu0 %vm79_vm0, %v679_v58  ;;  %3015 = vmatprep.subr.mxu0 %v3309_v2 }
 0x5b3   :  { %3016 = vmatpush3.msra.mxu0 %v3503_v53  ;;  %3023 = vmatprep.mubr.msk.f32.mxu0 %vm3310_vm1, %v3309_v2 }
 0x5b4   :  { %3017 = vmatprep.subr.mxu0 %v3309_v2 }
 0x5b5   :  { %3018 = vmatpush3.msra.mxu0 %v3515_v55 }
 0x5b6   :  { %3019 = vmatprep.subr.mxu0 %v3309_v2 }
 0x5b7   :  { %3020 = vmatpush3.msra.mxu0 %v3522_v56 }
 0x5b8   :  { %3021 = vmatprep.subr.mxu0 %v3309_v2 }
 0x5b9   :  { %3022 = vmatpush3.msra.mxu0 %v3541_v59 }
 0x5ba   :  { %3037 = vmatprep.subr.mxu0 %v3309_v2 }
 0x668   :  { %v748_v61 = vpop.f32.mrf.mxu1 }
 0x66a   :  { %v673_v62 = vpop.f32.mrf.mxu0  ;;  %v2992_v63 = vpop.f32.mrf.mxu1 }
 0x66b   :  { %v749_v0 = vadd.f32 %v748_v61, %v673_v62 }
 0x66c   :  { %v2981_v1 = vpop.f32.mrf.mxu0 }
 0x66d   :  { %v752_v4 = vadd.f32 %v3586_v3, %v749_v0 }
 0x66f   :  { %v2691_v5 = vmul.f32 -1.442695, %v752_v4 }
 0x671   :  { %3214 = vpow2.f32 %v2691_v5 }
 0x672   :  { %v845_v6 = vpop.f32.mrf.mxu0 }
 0x673   :  { %v849_v8 = vadd.f32 %v845_v6, %v3470_v25 }
 0x674   :  { %v3003_v10 = vpop.f32.mrf.mxu0 }
 0x675   :  { %v2694_v11 = vmul.f32 -1.442695, %v849_v8 }
 0x677   :  { %3216 = vpow2.f32 %v2694_v11 }
 0x67e   :  { %v3215_v14 = vpop.eup %3214 }
 0x67f   :  { %v756_v15 = vadd.f32 1.0, %v3215_v14 }
 0x681   :  { %3218 = vrcp.f32 %v756_v15 }
 0x684   :  { %v3217_v16 = vpop.eup %3216 }
 0x685   :  { %v853_v17 = vadd.f32 1.0, %v3217_v16 }
 0x687   :  { %3220 = vrcp.f32 %v853_v17 }
 0x68e   :  { %v3219_v18 = vpop.eup %3218 }
 0x68f   :  { %v759_v19 = vmul.f32 2.0, %v3219_v18  ;;  %v761_v32 = vmul.f32 %v3219_v18, %v3602_v44 }
 0x691   :  { %v2692_v21 = vadd.f32 -1.0, %v759_v19 }
 0x693   :  { %763 = vrot.lane.b32.xlu0 %v2692_v21, %s3311_s0 }
 0x694   :  { %v3221_v22 = vpop.eup %3220 }
 0x695   :  { %v856_v24 = vmul.f32 2.0, %v3221_v22  ;;  %v858_v36 = vmul.f32 %v3221_v22, %v3599_v42 }
 0x697   :  { %v2695_v26 = vadd.f32 -1.0, %v856_v24 }
 0x699   :  { %860 = vrot.lane.b32.xlu1 %v2695_v26, %s3311_s0 }
 0x705   :  { %v764_v25 = vpop.permute.xlu0 %763 }
 0x706   :  { %v766_v28 = vmul.f32 %v3219_v18, %v764_v25 }
 0x708   :  { %768 = vrot.lane.b32.xlu0 %v766_v28, %s3312_s23 }
 0x70b   :  { %v861_v30 = vpop.permute.xlu1 %860 }
 0x70c   :  { %v863_v20 = vmul.f32 %v3221_v22, %v861_v30 }
 0x70e   :  { %865 = vrot.lane.b32.xlu1 %v863_v20, %s3312_s23 }
 0x77a   :  { %v769_v33 = vpop.permute.xlu0 %768 }
 0x77b   :  { %v3649_v35 = vadd.f32 %v769_v33, %v761_v32 }
 0x77d   :  { %3222 = vtanh.f32 %v3649_v35 }
 0x780   :  { %v866_v37 = vpop.permute.xlu1 %865 }
 0x781   :  { %v3653_v38 = vadd.f32 %v866_v37, %v858_v36 }
 0x783   :  { %3224 = vtanh.f32 %v3653_v38 }
 0x78a   :  { %v3223_v39 = vpop.eup %3222 }
 0x78b   :  { %774 = vrot.lane.b32.xlu0 %v3223_v39, %s3311_s0 }
 0x790   :  { %v3225_v40 = vpop.eup %3224 }
 0x791   :  { %871 = vrot.lane.b32.xlu1 %v3225_v40, %s3311_s0 }
 0x7fd   :  { %v775_v41 = vpop.permute.xlu0 %774 }
 0x7fe   :  { %v777_v43 = vmul.f32 %v3219_v18, %v775_v41 }
 0x800   :  { %876 = vrot.lane.b32.xlu0 %v777_v43, %s3312_s23 }
 0x803   :  { %v872_v44 = vpop.permute.xlu1 %871 }
 0x804   :  { %v874_v45 = vmul.f32 %v3221_v22, %v872_v44 }
 0x806   :  { %951 = vrot.lane.b32.xlu1 %v874_v45, %s3312_s23 }
 0x872   :  { %v877_v42 = vpop.permute.xlu0 %876 }
 0x873   :  { %3013 = vmatmul.mubr.msk.f32.vlgmr.msra.gmra.mxu1 %vm79_vm0, %v877_v42 }
 0x874   :  { %3027 = vmatpush3.msra.mxu1 %v3404_v7  ;;  %3034 = vmatprep.mubr.msk.f32.mxu1 %vm3310_vm1, %v3309_v2 }
 0x875   :  { %3028 = vmatprep.subr.mxu1 %v3309_v2 }
 0x876   :  { %3029 = vmatpush3.msra.mxu1 %v3414_v9 }
 0x877   :  { %3030 = vmatprep.subr.mxu1 %v3309_v2 }
 0x878   :  { %3031 = vmatpush3.msra.mxu1 %v3428_v12  ;;  %v952_v46 = vpop.permute.xlu1 %951 }
 0x879   :  { %3024 = vmatmul.mubr.msk.f32.vlgmr.msra.gmra.mxu0 %vm79_vm0, %v952_v46  ;;  %3032 = vmatprep.subr.mxu1 %v3309_v2 }
 0x87a   :  { %3033 = vmatpush3.msra.mxu1 %v3436_v13  ;;  %3038 = vmatpush3.msra.mxu0 %v3492_v51 }
 0x87b   :  { %3035 = vmatmul.mubr.msk.f32.vlgmr.msra.gmra.mxu1 %vm79_vm0, %v952_v46  ;;  %3048 = vmatprep.subr.mxu1 %v3309_v2 }
 0x87c   :  { %3039 = vmatprep.subr.mxu0 %v3309_v2  ;;  %3049 = vmatpush3.msra.mxu1 %v3503_v53 }
 0x87d   :  { %3040 = vmatpush3.msra.mxu0 %v3497_v52  ;;  %3050 = vmatprep.subr.mxu1 %v3309_v2 }
 0x87e   :  { %3041 = vmatprep.subr.mxu0 %v3309_v2  ;;  %3051 = vmatpush3.msra.mxu1 %v3515_v55 }
 0x87f   :  { %3042 = vmatpush3.msra.mxu0 %v3509_v54  ;;  %3052 = vmatprep.subr.mxu1 %v3309_v2 }
 0x880   :  { %3043 = vmatprep.subr.mxu0 %v3309_v2  ;;  %3053 = vmatpush3.msra.mxu1 %v3522_v56 }
 0x881   :  { %3044 = vmatpush3.msra.mxu0 %v3528_v57  ;;  %3054 = vmatprep.subr.mxu1 %v3309_v2 }
 0x882   :  { %3055 = vmatpush3.msra.mxu1 %v3541_v59  ;;  %3056 = vmatprep.mubr.msk.f32.mxu1 %vm3310_vm1, %v3309_v2 }
 0x883   :  { %3045 = vmatprep.mubr.msk.f32.mxu0 %vm3310_vm1, %v3309_v2  ;;  %3059 = vmatprep.subr.mxu0 %v3309_v2 }
 0x884   :  { %3070 = vmatprep.subr.mxu1 %v3309_v2 }
 0x933   :  { %v946_v47 = vpop.f32.mrf.mxu1 }
 0x935   :  { %v3014_v48 = vpop.f32.mrf.mxu1 }
 0x939   :  { %v1021_v49 = vpop.f32.mrf.mxu0 }
 0x93a   :  { %v1022_v50 = vadd.f32 %v1021_v49, %v946_v47 }
 0x93b   :  { %v3025_v58 = vpop.f32.mrf.mxu0  ;;  %v1118_v60 = vpop.f32.mrf.mxu1 }
 0x93c   :  { %v1025_v61 = vadd.f32 %v3586_v3, %v1022_v50  ;;  %v1122_v62 = vadd.f32 %v1118_v60, %v3468_v23 }
 0x93d   :  { %v3036_v63 = vpop.f32.mrf.mxu1 }
 0x93e   :  { %v2698_v0 = vmul.f32 -1.442695, %v1025_v61  ;;  %v2701_v1 = vmul.f32 -1.442695, %v1122_v62 }
 0x940   :  { %3226 = vpow2.f32 %v2698_v0 }
 0x941   :  { %3228 = vpow2.f32 %v2701_v1 }
 0x94d   :  { %v3227_v4 = vpop.eup %3226 }
 0x94e   :  { %v3229_v5 = vpop.eup %3228  ;;  %v1029_v6 = vadd.f32 1.0, %v3227_v4 }
 0x94f   :  { %v1126_v8 = vadd.f32 1.0, %v3229_v5 }
 0x950   :  { %3230 = vrcp.f32 %v1029_v6 }
 0x951   :  { %3232 = vrcp.f32 %v1126_v8 }
 0x95d   :  { %v3231_v10 = vpop.eup %3230 }
 0x95e   :  { %v3233_v11 = vpop.eup %3232  ;;  %v1032_v14 = vmul.f32 2.0, %v3231_v10  ;;  %v1034_v22 = vmul.f32 %v3231_v10, %v3649_v35 }
 0x95f   :  { %v1129_v15 = vmul.f32 2.0, %v3233_v11  ;;  %v1131_v24 = vmul.f32 %v3233_v11, %v3653_v38 }
 0x960   :  { %v2699_v16 = vadd.f32 -1.0, %v1032_v14 }
 0x961   :  { %v2702_v17 = vadd.f32 -1.0, %v1129_v15 }
 0x962   :  { %1036 = vrot.lane.b32.xlu0 %v2699_v16, %s3311_s0 }
 0x963   :  { %1133 = vrot.lane.b32.xlu1 %v2702_v17, %s3311_s0 }
 0x9d4   :  { %v1037_v23 = vpop.permute.xlu0 %1036 }
 0x9d5   :  { %v1134_v18 = vpop.permute.xlu1 %1133  ;;  %v1039_v19 = vmul.f32 %v3231_v10, %v1037_v23 }
 0x9d6   :  { %v1136_v21 = vmul.f32 %v3233_v11, %v1134_v18 }
 0x9d7   :  { %1041 = vrot.lane.b32.xlu0 %v1039_v19, %s3312_s23 }
 0x9d8   :  { %1138 = vrot.lane.b32.xlu1 %v1136_v21, %s3312_s23 }
 0xa49   :  { %v1042_v26 = vpop.permute.xlu0 %1041 }
 0xa4a   :  { %v1139_v25 = vpop.permute.xlu1 %1138  ;;  %v3701_v28 = vadd.f32 %v1042_v26, %v1034_v22 }
 0xa4b   :  { %v3703_v30 = vadd.f32 %v1139_v25, %v1131_v24 }
 0xa4c   :  { %3234 = vtanh.f32 %v3701_v28 }
 0xa4d   :  { %3236 = vtanh.f32 %v3703_v30 }
 0xa59   :  { %v3235_v20 = vpop.eup %3234 }
 0xa5a   :  { %v3237_v32 = vpop.eup %3236  ;;  %1047 = vrot.lane.b32.xlu0 %v3235_v20, %s3311_s0 }
 0xa5b   :  { %1144 = vrot.lane.b32.xlu1 %v3237_v32, %s3311_s0 }
 0xacc   :  { %v1048_v33 = vpop.permute.xlu0 %1047 }
 0xacd   :  { %v1145_v35 = vpop.permute.xlu1 %1144  ;;  %v1050_v36 = vmul.f32 %v3231_v10, %v1048_v33 }
 0xace   :  { %v1147_v37 = vmul.f32 %v3233_v11, %v1145_v35 }
 0xacf   :  { %1149 = vrot.lane.b32.xlu0 %v1050_v36, %s3312_s23 }
 0xad0   :  { %1224 = vrot.lane.b32.xlu1 %v1147_v37, %s3312_s23 }
 0xb41   :  { %v1150_v38 = vpop.permute.xlu0 %1149 }
 0xb42   :  { %v1225_v39 = vpop.permute.xlu1 %1224  ;;  %3046 = vmatmul.mubr.msk.f32.vlgmr.msra.gmra.mxu0 %vm79_vm0, %v1150_v38 }
 0xb43   :  { %3057 = vmatmul.mubr.msk.f32.vlgmr.msra.gmra.mxu1 %vm79_vm0, %v1225_v39  ;;  %3060 = vmatpush3.msra.mxu0 %v3404_v7 }
 0xb44   :  { %3061 = vmatprep.subr.mxu0 %v3309_v2  ;;  %3067 = vmatprep.mubr.msk.f32.mxu0 %vm3310_vm1, %v3309_v2 }
 0xb45   :  { %3062 = vmatpush3.msra.mxu0 %v3414_v9  ;;  %3071 = vmatpush3.msra.mxu1 %v3492_v51 }
 0xb46   :  { %3063 = vmatprep.subr.mxu0 %v3309_v2  ;;  %3072 = vmatprep.subr.mxu1 %v3309_v2 }
 0xb47   :  { %3064 = vmatpush3.msra.mxu0 %v3428_v12  ;;  %3073 = vmatpush3.msra.mxu1 %v3497_v52 }
 0xb48   :  { %3065 = vmatprep.subr.mxu0 %v3309_v2  ;;  %3074 = vmatprep.subr.mxu1 %v3309_v2 }
 0xb49   :  { %3066 = vmatpush3.msra.mxu0 %v3436_v13  ;;  %3075 = vmatpush3.msra.mxu1 %v3509_v54 }
 0xb4a   :  { %3068 = vmatmul.mubr.msk.f32.vlgmr.msra.gmra.mxu0 %vm79_vm0, %v1225_v39  ;;  %3076 = vmatprep.subr.mxu1 %v3309_v2 }
 0xb4b   :  { %3081 = vmatprep.subr.mxu0 %v3309_v2  ;;  %3077 = vmatpush3.msra.mxu1 %v3528_v57 }
 0xb4c   :  { %3082 = vmatpush3.msra.mxu0 %v3503_v53  ;;  %3078 = vmatprep.mubr.msk.f32.mxu1 %vm3310_vm1, %v3309_v2 }
 0xb4d   :  { %3083 = vmatprep.subr.mxu0 %v3309_v2  ;;  %3092 = vmatprep.subr.mxu1 %v3309_v2 }
 0xb4e   :  { %3084 = vmatpush3.msra.mxu0 %v3515_v55  ;;  %3089 = vmatprep.mubr.msk.f32.mxu0 %vm3310_vm1, %v3309_v2 }
 0xb4f   :  { %3085 = vmatprep.subr.mxu0 %v3309_v2 }
 0xb50   :  { %3086 = vmatpush3.msra.mxu0 %v3522_v56 }
 0xb51   :  { %3087 = vmatprep.subr.mxu0 %v3309_v2 }
 0xb52   :  { %3088 = vmatpush3.msra.mxu0 %v3541_v59 }
 0xb53   :  { %3103 = vmatprep.subr.mxu0 %v3309_v2 }
 0xc02   :  { %v1219_v40 = vpop.f32.mrf.mxu0 }
 0xc03   :  { %v1294_v41 = vpop.f32.mrf.mxu1 }
 0xc04   :  { %v1295_v43 = vadd.f32 %v1294_v41, %v1219_v40  ;;  %v3047_v44 = vpop.f32.mrf.mxu0 }
 0xc05   :  { %v3058_v45 = vpop.f32.mrf.mxu1 }
 0xc06   :  { %v1298_v42 = vadd.f32 %v3586_v3, %v1295_v43 }
 0xc08   :  { %v2705_v46 = vmul.f32 -1.442695, %v1298_v42 }
 0xc0a   :  { %3238 = vpow2.f32 %v2705_v46  ;;  %v1391_v47 = vpop.f32.mrf.mxu0 }
 0xc0b   :  { %v1395_v48 = vadd.f32 %v1391_v47, %v3474_v29 }
 0xc0c   :  { %v3069_v49 = vpop.f32.mrf.mxu0 }
 0xc0d   :  { %v2708_v50 = vmul.f32 -1.442695, %v1395_v48 }
 0xc0f   :  { %3240 = vpow2.f32 %v2708_v50 }
 0xc17   :  { %v3239_v58 = vpop.eup %3238 }
 0xc18   :  { %v1302_v60 = vadd.f32 1.0, %v3239_v58 }
 0xc1a   :  { %3242 = vrcp.f32 %v1302_v60 }
 0xc1c   :  { %v3241_v61 = vpop.eup %3240 }
 0xc1d   :  { %v1399_v62 = vadd.f32 1.0, %v3241_v61 }
 0xc1f   :  { %3244 = vrcp.f32 %v1399_v62 }
 0xc27   :  { %v3243_v63 = vpop.eup %3242 }
 0xc28   :  { %v1305_v0 = vmul.f32 2.0, %v3243_v63  ;;  %v1307_v14 = vmul.f32 %v3243_v63, %v3701_v28 }
 0xc2a   :  { %v2706_v1 = vadd.f32 -1.0, %v1305_v0 }
 0xc2c   :  { %v3245_v4 = vpop.eup %3244  ;;  %1309 = vrot.lane.b32.xlu0 %v2706_v1, %s3311_s0 }
 0xc2d   :  { %v1402_v5 = vmul.f32 2.0, %v3245_v4  ;;  %v1404_v17 = vmul.f32 %v3245_v4, %v3703_v30 }
 0xc2f   :  { %v2709_v6 = vadd.f32 -1.0, %v1402_v5 }
 0xc31   :  { %1406 = vrot.lane.b32.xlu1 %v2709_v6, %s3311_s0 }
 0xc9e   :  { %v1310_v29 = vpop.permute.xlu0 %1309 }
 0xc9f   :  { %v1312_v8 = vmul.f32 %v3243_v63, %v1310_v29 }
 0xca1   :  { %1314 = vrot.lane.b32.xlu0 %v1312_v8, %s3312_s23 }
 0xca3   :  { %v1407_v10 = vpop.permute.xlu1 %1406 }
 0xca4   :  { %v1409_v11 = vmul.f32 %v3245_v4, %v1407_v10 }
 0xca6   :  { %1411 = vrot.lane.b32.xlu1 %v1409_v11, %s3312_s23 }
 0xd13   :  { %v1315_v15 = vpop.permute.xlu0 %1314 }
 0xd14   :  { %v3751_v16 = vadd.f32 %v1315_v15, %v1307_v14  ;;  %v3818_v15 = vld [vmem:[%s4103_s2 + $0x18] sm:$0xff] }
 0xd16   :  { %3246 = vtanh.f32 %v3751_v16 }
 0xd18   :  { %v1412_v23 = vpop.permute.xlu1 %1411 }
 0xd19   :  { %v3755_v18 = vadd.f32 %v1412_v23, %v1404_v17  ;;  %v3836_v17 = vld [vmem:[%s4103_s2 + $0x8] sm:$0xff] }
 0xd1b   :  { %3248 = vtanh.f32 %v3755_v18 }
 0xd23   :  { %v3247_v19 = vpop.eup %3246 }
 0xd24   :  { %1320 = vrot.lane.b32.xlu0 %v3247_v19, %s3311_s0 }
 0xd28   :  { %v3249_v21 = vpop.eup %3248 }
 0xd29   :  { %1417 = vrot.lane.b32.xlu1 %v3249_v21, %s3311_s0 }
 0xd96   :  { %v1321_v22 = vpop.permute.xlu0 %1320 }
 0xd97   :  { %v1323_v24 = vmul.f32 %v3243_v63, %v1321_v22 }
 0xd99   :  { %1422 = vrot.lane.b32.xlu0 %v1323_v24, %s3312_s23 }
 0xd9b   :  { %v1418_v26 = vpop.permute.xlu1 %1417 }
 0xd9c   :  { %v1420_v25 = vmul.f32 %v3245_v4, %v1418_v26 }
 0xd9e   :  { %1497 = vrot.lane.b32.xlu1 %v1420_v25, %s3312_s23 }
 0xe0b   :  { %v1423_v28 = vpop.permute.xlu0 %1422 }
 0xe0c   :  { %3079 = vmatmul.mubr.msk.f32.vlgmr.msra.gmra.mxu1 %vm79_vm0, %v1423_v28 }
 0xe0d   :  { %3093 = vmatpush3.msra.mxu1 %v3404_v7  ;;  %3100 = vmatprep.mubr.msk.f32.mxu1 %vm3310_vm1, %v3309_v2 }
 0xe0e   :  { %3094 = vmatprep.subr.mxu1 %v3309_v2 }
 0xe0f   :  { %3095 = vmatpush3.msra.mxu1 %v3414_v9 }
 0xe10   :  { %3096 = vmatprep.subr.mxu1 %v3309_v2  ;;  %v1498_v30 = vpop.permute.xlu1 %1497 }
 0xe11   :  { %3097 = vmatpush3.msra.mxu1 %v3428_v12  ;;  %3090 = vmatmul.mubr.msk.f32.vlgmr.msra.gmra.mxu0 %vm79_vm0, %v1498_v30 }
 0xe12   :  { %3098 = vmatprep.subr.mxu1 %v3309_v2  ;;  %3104 = vmatpush3.msra.mxu0 %v3492_v51 }
 0xe13   :  { %3099 = vmatpush3.msra.mxu1 %v3436_v13  ;;  %3105 = vmatprep.subr.mxu0 %v3309_v2 }
 0xe14   :  { %3101 = vmatmul.mubr.msk.f32.vlgmr.msra.gmra.mxu1 %vm79_vm0, %v1498_v30  ;;  %3114 = vmatprep.subr.mxu1 %v3309_v2 }
 0xe15   :  { %3115 = vmatpush3.msra.mxu1 %v3503_v53  ;;  %3106 = vmatpush3.msra.mxu0 %v3497_v52 }
 0xe16   :  { %3116 = vmatprep.subr.mxu1 %v3309_v2  ;;  %3107 = vmatprep.subr.mxu0 %v3309_v2 }
 0xe17   :  { %3117 = vmatpush3.msra.mxu1 %v3515_v55  ;;  %3108 = vmatpush3.msra.mxu0 %v3509_v54 }
 0xe18   :  { %3118 = vmatprep.subr.mxu1 %v3309_v2  ;;  %3109 = vmatprep.subr.mxu0 %v3309_v2 }
 0xe19   :  { %3119 = vmatpush3.msra.mxu1 %v3522_v56  ;;  %3110 = vmatpush3.msra.mxu0 %v3528_v57 }
 0xe1a   :  { %3120 = vmatprep.subr.mxu1 %v3309_v2  ;;  %3122 = vmatprep.mubr.msk.f32.mxu1 %vm3310_vm1, %v3309_v2 }
 0xe1b   :  { %3121 = vmatpush3.msra.mxu1 %v3541_v59  ;;  %3111 = vmatprep.mubr.msk.f32.mxu0 %vm3310_vm1, %v3309_v2 }
 0xe1c   :  { %3125 = vmatprep.subr.mxu0 %v3309_v2  ;;  %3136 = vmatprep.subr.mxu1 %v3309_v2 }
 0xecc   :  { %v1492_v7 = vpop.f32.mrf.mxu1 }
 0xece   :  { %v3080_v9 = vpop.f32.mrf.mxu1 }
 0xed1   :  { %v1567_v12 = vpop.f32.mrf.mxu0 }
 0xed2   :  { %v1568_v13 = vadd.f32 %v1567_v12, %v1492_v7 }
 0xed3   :  { %v3091_v20 = vpop.f32.mrf.mxu0 }
 0xed4   :  { %v1571_v32 = vadd.f32 %v3586_v3, %v1568_v13  ;;  %v1664_v33 = vpop.f32.mrf.mxu1 }
 0xed5   :  { %v1668_v35 = vadd.f32 %v1664_v33, %v3472_v27 }
 0xed6   :  { %v2712_v36 = vmul.f32 -1.442695, %v1571_v32  ;;  %v3102_v37 = vpop.f32.mrf.mxu1 }
 0xed7   :  { %v2715_v38 = vmul.f32 -1.442695, %v1668_v35 }
 0xed8   :  { %3250 = vpow2.f32 %v2712_v36 }
 0xed9   :  { %3252 = vpow2.f32 %v2715_v38 }
 0xee5   :  { %v3251_v39 = vpop.eup %3250 }
 0xee6   :  { %v3253_v40 = vpop.eup %3252  ;;  %v1575_v41 = vadd.f32 1.0, %v3251_v39 }
 0xee7   :  { %v1672_v43 = vadd.f32 1.0, %v3253_v40 }
 0xee8   :  { %3254 = vrcp.f32 %v1575_v41 }
 0xee9   :  { %3256 = vrcp.f32 %v1672_v43 }
 0xef5   :  { %v3255_v44 = vpop.eup %3254 }
 0xef6   :  { %v3257_v45 = vpop.eup %3256  ;;  %v1578_v42 = vmul.f32 2.0, %v3255_v44  ;;  %v1580_v60 = vmul.f32 %v3255_v44, %v3751_v16  ;;  %v3827_v16 = vld [vmem:[%s4103_s2 + $0x10] sm:$0xff] }
 0xef7   :  { %v1675_v46 = vmul.f32 2.0, %v3257_v45  ;;  %v1677_v61 = vmul.f32 %v3257_v45, %v3755_v18 }
 0xef8   :  { %v2713_v47 = vadd.f32 -1.0, %v1578_v42 }
 0xef9   :  { %v2716_v48 = vadd.f32 -1.0, %v1675_v46 }
 0xefa   :  { %1582 = vrot.lane.b32.xlu0 %v2713_v47, %s3311_s0 }
 0xefb   :  { %1679 = vrot.lane.b32.xlu1 %v2716_v48, %s3311_s0 }
 0xf6c   :  { %v1583_v27 = vpop.permute.xlu0 %1582 }
 0xf6d   :  { %v1680_v49 = vpop.permute.xlu1 %1679  ;;  %v1585_v50 = vmul.f32 %v3255_v44, %v1583_v27  ;;  %v3300_v27 = vld [vmem:[%s4103_s2 + $0x38] sm:$0xff] }
 0xf6e   :  { %v1682_v58 = vmul.f32 %v3257_v45, %v1680_v49  ;;  %v3301_v49 = vld [vmem:[%s4101_s1 + $0x38] sm:$0xff] }
 0xf6f   :  { %1587 = vrot.lane.b32.xlu0 %v1585_v50, %s3312_s23  ;;  %v3302_v50 = vld [vmem:[%s4103_s2 + $0x30] sm:$0xff] }
 0xf70   :  { %1684 = vrot.lane.b32.xlu1 %v1682_v58, %s3312_s23  ;;  %v3303_v58 = vld [vmem:[%s4101_s1 + $0x30] sm:$0xff] }
 0xfe1   :  { %v1588_v62 = vpop.permute.xlu0 %1587 }
 0xfe2   :  { %v1685_v63 = vpop.permute.xlu1 %1684  ;;  %v3803_v0 = vadd.f32 %v1588_v62, %v1580_v60  ;;  %v3304_v60 = vld [vmem:[%s4103_s2 + $0x28] sm:$0xff]  ;;  %v3306_v62 = vld [vmem:[%s4103_s2 + $0x20] sm:$0xff] }
 0xfe3   :  { %v3805_v1 = vadd.f32 %v1685_v63, %v1677_v61  ;;  %v3305_v61 = vld [vmem:[%s4101_s1 + $0x28] sm:$0xff]  ;;  %v3307_v63 = vld [vmem:[%s4101_s1 + $0x20] sm:$0xff] }
 0xfe4   :  { %3258 = vtanh.f32 %v3803_v0 }
 0xfe5   :  { %3260 = vtanh.f32 %v3805_v1 }
 0xff1   :  { %v3259_v4 = vpop.eup %3258 }
 0xff2   :  { %v3261_v5 = vpop.eup %3260  ;;  %1593 = vrot.lane.b32.xlu0 %v3259_v4, %s3311_s0 }
 0xff3   :  { %1690 = vrot.lane.b32.xlu1 %v3261_v5, %s3311_s0 }
0x1064   :  { %v1594_v6 = vpop.permute.xlu0 %1593 }
0x1065   :  { %v1691_v29 = vpop.permute.xlu1 %1690  ;;  %v1596_v8 = vmul.f32 %v3255_v44, %v1594_v6 }
0x1066   :  { %v1693_v10 = vmul.f32 %v3257_v45, %v1691_v29 }
0x1067   :  { %1695 = vrot.lane.b32.xlu0 %v1596_v8, %s3312_s23 }
0x1068   :  { %1770 = vrot.lane.b32.xlu1 %v1693_v10, %s3312_s23 }
0x10d9   :  { %v1696_v11 = vpop.permute.xlu0 %1695 }
0x10da   :  { %v1771_v14 = vpop.permute.xlu1 %1770  ;;  %3112 = vmatmul.mubr.msk.f32.vlgmr.msra.gmra.mxu0 %vm79_vm0, %v1696_v11 }
0x10db   :  { %3123 = vmatmul.mubr.msk.f32.vlgmr.msra.gmra.mxu1 %vm79_vm0, %v1771_v14  ;;  %3126 = vmatpush3.msra.mxu0 %v3818_v15 }
0x10dc   :  { %3127 = vmatprep.subr.mxu0 %v3309_v2  ;;  %3133 = vmatprep.mubr.msk.f32.mxu0 %vm3310_vm1, %v3309_v2 }
0x10dd   :  { %3128 = vmatpush3.msra.mxu0 %v3827_v16  ;;  %3137 = vmatpush3.msra.mxu1 %v3492_v51  ;;  %v3845_v51 = vld [vmem:[%s4103_s2] sm:$0xff] }
0x10de   :  { %3129 = vmatprep.subr.mxu0 %v3309_v2  ;;  %3138 = vmatprep.subr.mxu1 %v3309_v2 }
0x10df   :  { %3130 = vmatpush3.msra.mxu0 %v3836_v17  ;;  %3139 = vmatpush3.msra.mxu1 %v3497_v52 }
0x10e0   :  { %3131 = vmatprep.subr.mxu0 %v3309_v2  ;;  %3140 = vmatprep.subr.mxu1 %v3309_v2 }
0x10e1   :  { %3132 = vmatpush3.msra.mxu0 %v3845_v51  ;;  %3141 = vmatpush3.msra.mxu1 %v3509_v54 }
0x10e2   :  { %3134 = vmatmul.mubr.msk.f32.vlgmr.msra.gmra.mxu0 %vm79_vm0, %v1771_v14  ;;  %3142 = vmatprep.subr.mxu1 %v3309_v2 }
0x10e3   :  { %3147 = vmatprep.subr.mxu0 %v3309_v2  ;;  %3143 = vmatpush3.msra.mxu1 %v3528_v57 }
0x10e4   :  { %3148 = vmatpush3.msra.mxu0 %v3503_v53  ;;  %3144 = vmatprep.mubr.msk.f32.mxu1 %vm3310_vm1, %v3309_v2 }
0x10e5   :  { %3149 = vmatprep.subr.mxu0 %v3309_v2  ;;  %3158 = vmatprep.subr.mxu1 %v3309_v2 }
0x10e6   :  { %3150 = vmatpush3.msra.mxu0 %v3515_v55  ;;  %3155 = vmatprep.mubr.msk.f32.mxu0 %vm3310_vm1, %v3309_v2 }
0x10e7   :  { %3151 = vmatprep.subr.mxu0 %v3309_v2 }
0x10e8   :  { %3152 = vmatpush3.msra.mxu0 %v3522_v56 }
0x10e9   :  { %3153 = vmatprep.subr.mxu0 %v3309_v2 }
0x10ea   :  { %3154 = vmatpush3.msra.mxu0 %v3541_v59 }
0x10eb   :  { %3169 = vmatprep.subr.mxu0 %v3309_v2 }
0x119a   :  { %v1765_v52 = vpop.f32.mrf.mxu0 }
0x119b   :  { %v1840_v53 = vpop.f32.mrf.mxu1 }
0x119c   :  { %v1841_v54 = vadd.f32 %v1840_v53, %v1765_v52  ;;  %v3113_v57 = vpop.f32.mrf.mxu0 }
0x119d   :  { %v3124_v23 = vpop.f32.mrf.mxu1 }
0x119e   :  { %v1844_v55 = vadd.f32 %v3586_v3, %v1841_v54 }
0x11a0   :  { %v2719_v18 = vmul.f32 -1.442695, %v1844_v55 }
0x11a2   :  { %3262 = vpow2.f32 %v2719_v18  ;;  %v1937_v19 = vpop.f32.mrf.mxu0 }
0x11a3   :  { %v1941_v21 = vadd.f32 %v1937_v19, %v3478_v34 }
0x11a4   :  { %v3135_v22 = vpop.f32.mrf.mxu0 }
0x11a5   :  { %v2722_v56 = vmul.f32 -1.442695, %v1941_v21 }
0x11a7   :  { %3264 = vpow2.f32 %v2722_v56 }
0x11af   :  { %v3263_v24 = vpop.eup %3262 }
0x11b0   :  { %v1848_v26 = vadd.f32 1.0, %v3263_v24 }
0x11b2   :  { %3266 = vrcp.f32 %v1848_v26 }
0x11b4   :  { %v3265_v59 = vpop.eup %3264 }
0x11b5   :  { %v1945_v25 = vadd.f32 1.0, %v3265_v59 }
0x11b7   :  { %3268 = vrcp.f32 %v1945_v25 }
0x11bf   :  { %v3267_v28 = vpop.eup %3266 }
0x11c0   :  { %v1851_v30 = vmul.f32 2.0, %v3267_v28  ;;  %v1853_v35 = vmul.f32 %v3267_v28, %v3803_v0 }
0x11c2   :  { %v2720_v7 = vadd.f32 -1.0, %v1851_v30 }
0x11c4   :  { %v3269_v9 = vpop.eup %3268  ;;  %1855 = vrot.lane.b32.xlu0 %v2720_v7, %s3311_s0 }
0x11c5   :  { %v1948_v12 = vmul.f32 2.0, %v3269_v9  ;;  %v1950_v38 = vmul.f32 %v3269_v9, %v3805_v1 }
0x11c7   :  { %v2723_v13 = vadd.f32 -1.0, %v1948_v12 }
0x11c9   :  { %1952 = vrot.lane.b32.xlu1 %v2723_v13, %s3311_s0 }
0x1236   :  { %v1856_v34 = vpop.permute.xlu0 %1855 }
0x1237   :  { %v1858_v20 = vmul.f32 %v3267_v28, %v1856_v34 }
0x1239   :  { %1860 = vrot.lane.b32.xlu0 %v1858_v20, %s3312_s23 }
0x123b   :  { %v1953_v32 = vpop.permute.xlu1 %1952 }
0x123c   :  { %v1955_v33 = vmul.f32 %v3269_v9, %v1953_v32 }
0x123e   :  { %1957 = vrot.lane.b32.xlu1 %v1955_v33, %s3312_s23 }
0x12ab   :  { %v1861_v36 = vpop.permute.xlu0 %1860 }
0x12ac   :  { %v3873_v37 = vadd.f32 %v1861_v36, %v1853_v35 }
0x12ae   :  { %3270 = vtanh.f32 %v3873_v37 }
0x12b0   :  { %v1958_v39 = vpop.permute.xlu1 %1957 }
0x12b1   :  { %v3877_v40 = vadd.f32 %v1958_v39, %v1950_v38  ;;  %v3308_v38 = vld [vmem:[%s4105_s3 + $0x1] ss:$0 sm:$0xff] }
0x12b3   :  { %3272 = vtanh.f32 %v3877_v40 }
0x12bb   :  { %v3271_v41 = vpop.eup %3270 }
0x12bc   :  { %1866 = vrot.lane.b32.xlu0 %v3271_v41, %s3311_s0 }
0x12c0   :  { %v3273_v43 = vpop.eup %3272 }
0x12c1   :  { %1963 = vrot.lane.b32.xlu1 %v3273_v43, %s3311_s0 }
0x132e   :  { %v1867_v44 = vpop.permute.xlu0 %1866 }
0x132f   :  { %v1869_v45 = vmul.f32 %v3267_v28, %v1867_v44 }
0x1331   :  { %1968 = vrot.lane.b32.xlu0 %v1869_v45, %s3312_s23 }
0x1333   :  { %v1964_v42 = vpop.permute.xlu1 %1963 }
0x1334   :  { %v1966_v46 = vmul.f32 %v3269_v9, %v1964_v42 }
0x1336   :  { %2043 = vrot.lane.b32.xlu1 %v1966_v46, %s3312_s23 }
0x13a3   :  { %v1969_v47 = vpop.permute.xlu0 %1968 }
0x13a4   :  { %3145 = vmatmul.mubr.msk.f32.vlgmr.msra.gmra.mxu1 %vm79_vm0, %v1969_v47 }
0x13a5   :  { %3159 = vmatpush3.msra.mxu1 %v3818_v15  ;;  %3166 = vmatprep.mubr.msk.f32.mxu1 %vm3310_vm1, %v3309_v2 }
0x13a6   :  { %3160 = vmatprep.subr.mxu1 %v3309_v2 }
0x13a7   :  { %3161 = vmatpush3.msra.mxu1 %v3827_v16 }
0x13a8   :  { %3162 = vmatprep.subr.mxu1 %v3309_v2  ;;  %v2044_v48 = vpop.permute.xlu1 %2043 }
0x13a9   :  { %3163 = vmatpush3.msra.mxu1 %v3836_v17  ;;  %3156 = vmatmul.mubr.msk.f32.vlgmr.msra.gmra.mxu0 %vm79_vm0, %v2044_v48 }
0x13aa   :  { %3164 = vmatprep.subr.mxu1 %v3309_v2  ;;  %3170 = vmatpush3.msra.mxu0 %v3300_v27 }
0x13ab   :  { %3165 = vmatpush3.msra.mxu1 %v3845_v51  ;;  %3171 = vmatprep.subr.mxu0 %v3309_v2 }
0x13ac   :  { %3167 = vmatmul.mubr.msk.f32.vlgmr.msra.gmra.mxu1 %vm79_vm0, %v2044_v48  ;;  %3180 = vmatprep.subr.mxu1 %v3309_v2 }
0x13ad   :  { %3181 = vmatpush3.msra.mxu1 %v3301_v49  ;;  %3172 = vmatpush3.msra.mxu0 %v3302_v50  ;;  %v2442_v49 = vld [vmem:[%s4108_s4 + $0x38] sm:$0xff]  ;;  %v2441_v50 = vld [vmem:[%s4108_s4 + $0x30] sm:$0xff] }
0x13ae   :  { %3182 = vmatprep.subr.mxu1 %v3309_v2  ;;  %3173 = vmatprep.subr.mxu0 %v3309_v2 }
0x13af   :  { %3183 = vmatpush3.msra.mxu1 %v3303_v58  ;;  %3174 = vmatpush3.msra.mxu0 %v3304_v60  ;;  %v2440_v58 = vld [vmem:[%s4108_s4 + $0x28] sm:$0xff]  ;;  %v2439_v60 = vld [vmem:[%s4108_s4 + $0x20] sm:$0xff] }
0x13b0   :  { %3184 = vmatprep.subr.mxu1 %v3309_v2  ;;  %3175 = vmatprep.subr.mxu0 %v3309_v2 }
0x13b1   :  { %3185 = vmatpush3.msra.mxu1 %v3305_v61  ;;  %3188 = vmatprep.mubr.msk.f32.mxu1 %vm3310_vm1, %v3309_v2  ;;  %v2438_v61 = vld [vmem:[%s4108_s4 + $0x18] sm:$0xff] }
0x13b2   :  { %3186 = vmatprep.subr.mxu1 %v3309_v2  ;;  %3176 = vmatpush3.msra.mxu0 %v3306_v62  ;;  %v2437_v62 = vld [vmem:[%s4108_s4 + $0x10] sm:$0xff] }
0x13b3   :  { %3187 = vmatpush3.msra.mxu1 %v3307_v63  ;;  %3177 = vmatprep.mubr.msk.f32.mxu0 %vm3310_vm1, %v3309_v2  ;;  %v2436_v63 = vld [vmem:[%s4108_s4 + $0x8] sm:$0xff] }
0x13b4   :  { %2481 = vmatprep.subr.mxu0 %v2442_v49 }
0x1464   :  { %v2038_v0 = vpop.f32.mrf.mxu1 }
0x1466   :  { %v3146_v1 = vpop.f32.mrf.mxu1 }
0x1467   :  { %v2435_v1 = vld [vmem:[%s4108_s4] sm:$0xff] }
0x1469   :  { %v2113_v4 = vpop.f32.mrf.mxu0 }
0x146a   :  { %v2114_v5 = vadd.f32 %v2113_v4, %v2038_v0  ;;  %v2561_v4 = vld [vmem:[%s4109_s6 + $0xf8] sm:$0xff] }
0x146b   :  { %v3157_v6 = vpop.f32.mrf.mxu0  ;;  %2872 = vmatprep.subr.mxu1 %v2561_v4 }
0x146c   :  { %v2117_v29 = vadd.f32 %v3586_v3, %v2114_v5  ;;  %v2210_v8 = vpop.f32.mrf.mxu1  ;;  %v2545_v5 = vld [vmem:[%s4109_s6 + $0x78] sm:$0xff]  ;;  %v2560_v6 = vld [vmem:[%s4109_s6 + $0xf0] sm:$0xff] }
0x146d   :  { %v2214_v10 = vadd.f32 %v2210_v8, %v3476_v31  ;;  %v2559_v8 = vld [vmem:[%s4109_s6 + $0xe8] sm:$0xff] }
0x146e   :  { %v2726_v11 = vmul.f32 -1.442695, %v2117_v29  ;;  %v3168_v14 = vpop.f32.mrf.mxu1  ;;  %v2544_v29 = vld [vmem:[%s4109_s6 + $0x70] sm:$0xff] }
0x146f   :  { %v2729_v15 = vmul.f32 -1.442695, %v2214_v10  ;;  %v2543_v10 = vld [vmem:[%s4109_s6 + $0x68] sm:$0xff] }
0x1470   :  { %3274 = vpow2.f32 %v2726_v11  ;;  %v2558_v11 = vld [vmem:[%s4109_s6 + $0xe0] sm:$0xff] }
0x1471   :  { %3276 = vpow2.f32 %v2729_v15  ;;  %v2542_v15 = vld [vmem:[%s4109_s6 + $0x60] sm:$0xff] }
0x147d   :  { %v3275_v16 = vpop.eup %3274 }
0x147e   :  { %v3277_v17 = vpop.eup %3276  ;;  %v2121_v51 = vadd.f32 1.0, %v3275_v16 }
0x147f   :  { %v2218_v52 = vadd.f32 1.0, %v3277_v17  ;;  %v2557_v17 = vld [vmem:[%s4109_s6 + $0xd8] sm:$0xff] }
0x1480   :  { %3278 = vrcp.f32 %v2121_v51  ;;  %v2541_v51 = vld [vmem:[%s4109_s6 + $0x58] sm:$0xff] }
0x1481   :  { %3280 = vrcp.f32 %v2218_v52  ;;  %v2556_v52 = vld [vmem:[%s4109_s6 + $0xd0] sm:$0xff] }
0x148d   :  { %v3279_v53 = vpop.eup %3278 }
0x148e   :  { %v3281_v54 = vpop.eup %3280  ;;  %v2124_v57 = vmul.f32 2.0, %v3279_v53  ;;  %v2126_v22 = vmul.f32 %v3279_v53, %v3873_v37 }
0x148f   :  { %v2221_v23 = vmul.f32 2.0, %v3281_v54  ;;  %v2223_v56 = vmul.f32 %v3281_v54, %v3877_v40 }
0x1490   :  { %v2727_v55 = vadd.f32 -1.0, %v2124_v57  ;;  %v2555_v57 = vld [vmem:[%s4109_s6 + $0xc8] sm:$0xff] }
0x1491   :  { %v2730_v3 = vadd.f32 -1.0, %v2221_v23  ;;  %v2539_v23 = vld [vmem:[%s4109_s6 + $0x48] sm:$0xff] }
0x1492   :  { %2128 = vrot.lane.b32.xlu0 %v2727_v55, %s3311_s0  ;;  %v2554_v55 = vld [vmem:[%s4109_s6 + $0xc0] sm:$0xff] }
0x1493   :  { %2225 = vrot.lane.b32.xlu1 %v2730_v3, %s3311_s0  ;;  %v2538_v3 = vld [vmem:[%s4109_s6 + $0x40] sm:$0xff] }
0x1504   :  { %v2129_v31 = vpop.permute.xlu0 %2128 }
0x1505   :  { %v2226_v18 = vpop.permute.xlu1 %2225  ;;  %v2131_v19 = vmul.f32 %v3279_v53, %v2129_v31  ;;  %v2553_v31 = vld [vmem:[%s4109_s6 + $0xb8] sm:$0xff] }
0x1506   :  { %v2228_v21 = vmul.f32 %v3281_v54, %v2226_v18  ;;  %v2537_v18 = vld [vmem:[%s4109_s6 + $0x38] sm:$0xff] }
0x1507   :  { %2133 = vrot.lane.b32.xlu0 %v2131_v19, %s3312_s23  ;;  %v2552_v19 = vld [vmem:[%s4109_s6 + $0xb0] sm:$0xff] }
0x1508   :  { %2230 = vrot.lane.b32.xlu1 %v2228_v21, %s3312_s23  ;;  %v2536_v21 = vld [vmem:[%s4109_s6 + $0x30] sm:$0xff] }
0x1579   :  { %v2134_v24 = vpop.permute.xlu0 %2133 }
0x157a   :  { %v2231_v26 = vpop.permute.xlu1 %2230  ;;  %v2136_v59 = vadd.f32 %v2134_v24, %v2126_v22  ;;  %v2551_v22 = vld [vmem:[%s4109_s6 + $0xa8] sm:$0xff]  ;;  %v2550_v24 = vld [vmem:[%s4109_s6 + $0xa0] sm:$0xff] }
0x157b   :  { %v2233_v25 = vadd.f32 %v2231_v26, %v2223_v56  ;;  %v2535_v56 = vld [vmem:[%s4109_s6 + $0x28] sm:$0xff]  ;;  %v2534_v26 = vld [vmem:[%s4109_s6 + $0x20] sm:$0xff] }
0x157c   :  { %3282 = vtanh.f32 %v2136_v59 }
0x157d   :  { %3284 = vtanh.f32 %v2233_v25 }
0x1589   :  { %v3283_v28 = vpop.eup %3282 }
0x158a   :  { %v3285_v30 = vpop.eup %3284  ;;  %2139 = vrot.lane.b32.xlu0 %v3283_v28, %s3311_s0  ;;  %v2549_v28 = vld [vmem:[%s4109_s6 + $0x98] sm:$0xff] }
0x158b   :  { %2236 = vrot.lane.b32.xlu1 %v3285_v30, %s3311_s0  ;;  %v2533_v30 = vld [vmem:[%s4109_s6 + $0x18] sm:$0xff] }
0x15fc   :  { %v2140_v7 = vpop.permute.xlu0 %2139 }
0x15fd   :  { %v2237_v9 = vpop.permute.xlu1 %2236  ;;  %v2142_v12 = vmul.f32 %v3279_v53, %v2140_v7  ;;  %v2548_v7 = vld [vmem:[%s4109_s6 + $0x90] sm:$0xff] }
0x15fe   :  { %v2239_v13 = vmul.f32 %v3281_v54, %v2237_v9  ;;  %v2540_v54 = vld [vmem:[%s4109_s6 + $0x50] sm:$0xff] }
0x15ff   :  { %2241 = vrot.lane.b32.xlu0 %v2142_v12, %s3312_s23  ;;  %v2532_v9 = vld [vmem:[%s4109_s6 + $0x10] sm:$0xff]  ;;  %v2547_v12 = vld [vmem:[%s4109_s6 + $0x88] sm:$0xff] }
0x1600   :  { %2316 = vrot.lane.b32.xlu1 %v2239_v13, %s3312_s23  ;;  %v2531_v13 = vld [vmem:[%s4109_s6 + $0x8] sm:$0xff] }
0x1671   :  { %v2242_v34 = vpop.permute.xlu0 %2241 }
0x1672   :  { %v2317_v20 = vpop.permute.xlu1 %2316  ;;  %3178 = vmatmul.mubr.msk.f32.vlgmr.msra.gmra.mxu0 %vm79_vm0, %v2242_v34  ;;  %v2546_v34 = vld [vmem:[%s4109_s6 + $0x80] sm:$0xff] }
0x1673   :  { %2417 = vst.msk [vmem:[%s4107_s11] sm:$0xff] %vm79_vm0, %v2317_v20  ;;  %3189 = vmatmul.mubr.msk.f32.vlgmr.msra.gmra.mxu1 %vm79_vm0, %v2317_v20  ;;  %2521 = vmatprep.mubr.f32.mxu0 %v3309_v2  ;;  %v2530_v20 = vld [vmem:[%s4109_s6] sm:$0xff] }
0x1674   :  { %2482 = vmatpush1.msra.mxu0 %v2441_v50  ;;  %2873 = vmatpush3.msra.mxu1 %v2545_v5 }
0x1675   :  { %2483 = vmatprep.subr.mxu0 %v2440_v58  ;;  %2874 = vmatprep.subr.mxu1 %v2560_v6 }
0x1676   :  { %2484 = vmatpush1.msra.mxu0 %v2439_v60  ;;  %2875 = vmatpush3.msra.mxu1 %v2544_v29 }
0x1677   :  { %2485 = vmatprep.subr.mxu0 %v2438_v61  ;;  %2876 = vmatprep.subr.mxu1 %v2559_v8 }
0x1678   :  { %2486 = vmatpush1.msra.mxu0 %v2437_v62  ;;  %2877 = vmatpush3.msra.mxu1 %v2543_v10 }
0x1679   :  { %2487 = vmatprep.subr.mxu0 %v2436_v63  ;;  %2878 = vmatprep.subr.mxu1 %v2558_v11 }
0x167a   :  { %2488 = vmatpush1.msra.mxu0 %v2435_v1  ;;  %2879 = vmatpush3.msra.mxu1 %v2542_v15 }
0x167b   :  { %2880 = vmatprep.subr.mxu1 %v2557_v17 }
0x167c   :  { %2881 = vmatpush3.msra.mxu1 %v2541_v51 }
0x167d   :  { %2882 = vmatprep.subr.mxu1 %v2556_v52 }
0x167e   :  { %2883 = vmatpush3.msra.mxu1 %v2540_v54 }
0x167f   :  { %2884 = vmatprep.subr.mxu1 %v2555_v57 }
0x1680   :  { %2885 = vmatpush3.msra.mxu1 %v2539_v23 }
0x1681   :  { %2886 = vmatprep.subr.mxu1 %v2554_v55 }
0x1682   :  { %2887 = vmatpush3.msra.mxu1 %v2538_v3 }
0x1683   :  { %2888 = vmatprep.subr.mxu1 %v2553_v31 }
0x1684   :  { %2889 = vmatpush3.msra.mxu1 %v2537_v18 }
0x1685   :  { %2890 = vmatprep.subr.mxu1 %v2552_v19 }
0x1686   :  { %2891 = vmatpush3.msra.mxu1 %v2536_v21 }
0x1687   :  { %2892 = vmatprep.subr.mxu1 %v2551_v22 }
0x1688   :  { %2893 = vmatpush3.msra.mxu1 %v2535_v56 }
0x1689   :  { %2894 = vmatprep.subr.mxu1 %v2550_v24 }
0x168a   :  { %2895 = vmatpush3.msra.mxu1 %v2534_v26 }
0x168b   :  { %2896 = vmatprep.subr.mxu1 %v2549_v28 }
0x168c   :  { %2897 = vmatpush3.msra.mxu1 %v2533_v30 }
0x168d   :  { %2898 = vmatprep.subr.mxu1 %v2548_v7 }
0x168e   :  { %2899 = vmatpush3.msra.mxu1 %v2532_v9 }
0x168f   :  { %2900 = vmatprep.subr.mxu1 %v2547_v12 }
0x1690   :  { %2901 = vmatpush3.msra.mxu1 %v2531_v13 }
0x1691   :  { %2902 = vmatprep.subr.mxu1 %v2546_v34 }
0x1692   :  { %2903 = vmatpush3.msra.mxu1 %v2530_v20 }
0x1732   :  { %v2311_v32 = vpop.f32.mrf.mxu0 }
0x1733   :  { %v2386_v33 = vpop.f32.mrf.mxu1 }
0x1734   :  { %v2387_v35 = vadd.f32 %v2386_v33, %v2311_v32  ;;  %v3179_v36 = vpop.f32.mrf.mxu0  ;;  %v2445_v32 = vlaneseq }
0x1735   :  { %v3190_v37 = vpop.f32.mrf.mxu1  ;;  %v2443_v36 = vld [vmem:[%s4111_s5] sm:$0x3] }
0x1736   :  { %v2390_v39 = vadd.f32 %v3308_v38, %v2387_v35  ;;  %v2446_v33 = vshrl.u32 %v2445_v32, 7 }
0x1738   :  { %v2733_v40 = vmul.f32 -1.442695, %v2390_v39  ;;  %v2447_v35 = vsub.s32 0, %v2446_v33  ;;  %v2451_v37 = vsub.s32 1, %v2446_v33 }
0x173a   :  { %3286 = vpow2.f32 %v2733_v40  ;;  %v2448_v38 = vrot.slane %v2443_v36, %v2447_v35  ;;  %v2452_v39 = vrot.slane %v2443_v36, %v2451_v37 }
0x1747   :  { %v3287_v41 = vpop.eup %3286 }
0x1748   :  { %v2394_v43 = vadd.f32 1.0, %v3287_v41 }
0x174a   :  { %3288 = vrcp.f32 %v2394_v43 }
0x1757   :  { %v3289_v44 = vpop.eup %3288 }
0x1758   :  { %v2397_v45 = vmul.f32 2.0, %v3289_v44  ;;  %v2399_v47 = vmul.f32 %v3289_v44, %v2136_v59 }
0x175a   :  { %v2734_v42 = vadd.f32 -1.0, %v2397_v45 }
0x175c   :  { %2401 = vrot.lane.b32.xlu0 %v2734_v42, %s3311_s0 }
0x17ce   :  { %v2402_v2 = vpop.permute.xlu0 %2401 }
0x17cf   :  { %v2404_v46 = vmul.f32 %v3289_v44, %v2402_v2 }
0x17d1   :  { %2406 = vrot.lane.b32.xlu1 %v2404_v46, %s3312_s23  ;;  %v2738_v46 = vld [vmem:[%s4112_s7] ss:$0 sm:$0xff] }
0x1843   :  { %v2407_v48 = vpop.permute.xlu1 %2406 }
0x1844   :  { %v2409_v27 = vadd.f32 %v2407_v48, %v2399_v47 }
0x1846   :  { %3290 = vtanh.f32 %v2409_v27 }
0x1853   :  { %v3291_v0 = vpop.eup %3290 }
0x1854   :  { %2412 = vrot.lane.b32.xlu0 %v3291_v0, %s3311_s0 }
0x1858   :  { %2419 = vrot.lane.b32.xlu0 %v2233_v25, %s3313_s30 }
0x18c6   :  { %v2413_v14 = vpop.permute.xlu0 %2412 }
0x18c7   :  { %v2415_v16 = vmul.f32 %v3289_v44, %v2413_v14 }
0x18c9   :  { %2424 = vrot.lane.b32.xlu1 %v2415_v16, %s3312_s23 }
0x18ca   :  { %v2420_v53 = vpop.permute.xlu0 %2419 }
0x18cb   :  { %2422 = vst.msk [vmem:[%s4110_s12] sm:$0xff] %vm79_vm0, %v2420_v53 }
0x18cd   :  { %2430 = vrot.lane.b32.xlu1 %v2409_v27, %s3313_s30 }
0x193b   :  { %v2425_v59 = vpop.permute.xlu1 %2424 }
0x193c   :  { %2735 = vst.msk [vmem:[%s4107_s11 + $0x8] sm:$0xff] %vm79_vm0, %v2425_v59  ;;  %2737 = vmatmul.mubr.msk.f32.vlgmr.msra.gmra.mxu0 %vm79_vm0, %v2425_v59 }
0x193f   :  { %v2431_v25 = vpop.permute.xlu1 %2430 }
0x1940   :  { %2736 = vst.msk [vmem:[%s4110_s12 + $0x8] sm:$0xff] %vm79_vm0, %v2431_v25 }
0x19fc   :  { %v2523_v40 = vpop.f32.mrf.mxu0 }
0x19fd   :  { %v2524_v41 = vadd.f32 %v2523_v40, %v2448_v38 }
0x19fe   :  { %v2525_v43 = vpop.f32.mrf.mxu0 }
0x19ff   :  { %v2526_v44 = vadd.f32 %v2525_v43, %v2452_v39  ;;  %v2528_v42 = vmax.f32 %v2524_v41, 0.0 }
0x1a01   :  { %v2529_v45 = vmax.f32 %v2526_v44, 0.0 }
0x1a03   :  { %2633 = vmatprep.mubr.f32.mxu1 %v2529_v45 }
0x1a04   :  { %2634 = vmatmul.mubr.f32.vlgmr.msra.gmra.mxu1 %v2528_v42 }
0x1ac4   :  { %v2904_v2 = vpop.f32.mrf.mxu1 }
0x1ac6   :  { %v2905_v47 = vpop.f32.mrf.mxu1 }
0x1ac7   :  { %v2906_v48 = vadd.f32 %v2905_v47, %v2904_v2 }
0x1ac9   :  { %v2636_v27 = vadd.f32 %v2906_v48, %v2738_v46 }
0x1acb   :  { %v2739_v49 = vmul.f32 -1.442695, %v2636_v27 }
0x1acd   :  { %3292 = vpow2.f32 %v2739_v49 }
0x1ada   :  { %v3293_v50 = vpop.eup %3292 }
0x1adb   :  { %v2642_v58 = vadd.f32 1.0, %v3293_v50 }
0x1add   :  { %3294 = vrcp.f32 %v2642_v58 }
0x1aea   :  { %v3295_v60 = vpop.eup %3294 }
0x1aeb   :  { %2645 = vst [vmem:[%s4113_s10] sm:$0xff] %v3295_v60 }

</bundles_post_ra>
